<compile_context>
chip_gen: v6e
topology: v6e:2x2x1
jax: 0.10.0
libtpu: 0.0.40
codegen_flags: <defaults>
</compile_context>

<pallas_src>
import jax
import jax.numpy as jnp
import numpy as np
from jax.experimental import pallas as pl
from jax.experimental.pallas import tpu as pltpu

# ---- module hyper-parameters (consistent with the PyTorch module) ----
N_CHARS = 30
N_WORDS = 50
HIDDEN = 32
CHAR_EMB = 25                     # char_embedding_dim
CHAR_REP = 25                     # char_representation_dim (conv out channels)
WORD_EMB_DIM = HIDDEN - CHAR_REP  # 7
L = 8                             # characters per word (fixed for the kernel)
KH = 3                            # conv kernel height
PAD = 2                           # conv padding along the char axis
T = L + 2 * PAD - KH + 1          # conv output length = 10
TP = ((T + 7) // 8) * 8           # padded to a sublane-aligned 16 rows/word
SEQ = 8                           # number of words processed per forward


def encoder_kernel(mh_ref, ohw_ref,                    # index encodings (f32)
                   cw_ref, wihc_ref, ww_ref, bih_ref,  # packed parameter slabs
                   whh_ref, bhh_ref, h0_ref,
                   out_ref,                            # (S, H) all per-step outputs
                   crep_sc):                           # (S, C_out) VMEM scratch
    S = out_ref.shape[0]
    H = out_ref.shape[1]
    C = cw_ref.shape[1]

    # ---------- parallel stage: all S words at once ----------
    # Char CNN for every word & time position as ONE matmul:
    #   (S*TP, KH*N_CHARS) multi-hot  @  (KH*N_CHARS, C_out) char_table-folded taps
    conv = jnp.dot(mh_ref[...], cw_ref[...],
                   preferred_element_type=jnp.float32)        # (S*TP, C_out)

    # Per-word max-pool over the TP padded time rows (dummy rows duplicate t=0,
    # so they never change the max).  Aligned static slices + sublane reduce.
    for s in range(S):
        blk = conv[s * TP:(s + 1) * TP, :]                    # (TP, C_out)
        crep_sc[s:s + 1, :] = jnp.max(blk, axis=0, keepdims=True)
    char_rep = crep_sc[...]                                   # (S, C_out)

    # Input projection for ALL steps (conv bias + b_ih already folded in bih):
    #   gi = char_rep @ Wih_char^T + onehot_word @ (word_table @ Wih_word^T) + b_ih'
    gi = (jnp.dot(char_rep, wihc_ref[...], preferred_element_type=jnp.float32)
          + jnp.dot(ohw_ref[...], ww_ref[...], preferred_element_type=jnp.float32)
          + bih_ref[...])                                     # (S, 3H)

    # ---------- serial GRU recurrence: unrolled, h carried in vregs ----------
    whh = whh_ref[...]                                        # (H, 3H)
    bhh = bhh_ref[...]                                        # (1, 3H)
    h = h0_ref[...]                                           # (1, H)
    for s in range(S):
        gh = jnp.dot(h, whh, preferred_element_type=jnp.float32) + bhh   # (1, 3H)
        gi_s = gi[s:s + 1, :]
        r = jax.nn.sigmoid(gi_s[:, 0:H] + gh[:, 0:H])
        z = jax.nn.sigmoid(gi_s[:, H:2 * H] + gh[:, H:2 * H])
        n = jnp.tanh(gi_s[:, 2 * H:3 * H] + r * gh[:, 2 * H:3 * H])
        h = (1.0 - z) * n + z * h
        out_ref[s:s + 1, :] = h                               # resident output block


def make_params(key):
    ks = jax.random.split(key, 8)
    # Embedding init per initEmbedding: uniform(-sqrt(3/dim), sqrt(3/dim))
    b_emb = float(np.sqrt(3.0 / CHAR_EMB))
    char_table = jax.random.uniform(ks[0], (N_CHARS, CHAR_EMB), jnp.float32, -b_emb, b_emb)
    word_table = jax.random.uniform(ks[1], (N_WORDS, WORD_EMB_DIM), jnp.float32, -0.1, 0.1)
    # Conv2d weight (out, in=1, 3, E) and bias
    b_conv = float(np.sqrt(1.0 / (KH * CHAR_EMB)))
    conv_w = jax.random.uniform(ks[2], (CHAR_REP, 1, KH, CHAR_EMB), jnp.float32, -b_conv, b_conv)
    conv_b = jax.random.uniform(ks[3], (CHAR_REP,), jnp.float32, -b_conv, b_conv)
    # GRU weights (PyTorch layout: (3H, H), gate order r, z, n)
    b_gru = float(np.sqrt(1.0 / HIDDEN))
    w_ih = jax.random.uniform(ks[4], (3 * HIDDEN, HIDDEN), jnp.float32, -b_gru, b_gru)
    w_hh = jax.random.uniform(ks[5], (3 * HIDDEN, HIDDEN), jnp.float32, -b_gru, b_gru)
    b_ih = jax.random.uniform(ks[6], (3 * HIDDEN,), jnp.float32, -b_gru, b_gru)
    b_hh = jax.random.uniform(ks[7], (3 * HIDDEN,), jnp.float32, -b_gru, b_gru)
    return dict(char_table=char_table, word_table=word_table, conv_w=conv_w,
                conv_b=conv_b, w_ih=w_ih, w_hh=w_hh, b_ih=b_ih, b_hh=b_hh)


def pack_params(p):
    """One-time re-layout of PyTorch-style parameters into kernel slabs."""
    # Char table folded into each conv tap: CW[k*N_CHARS + c, :] = char_table[c] @ W_k^T
    cw = jnp.concatenate(
        [p["char_table"] @ p["conv_w"][:, 0, k, :].T for k in range(KH)], axis=0)  # (KH*NC, C_out)
    w_ih_t = p["w_ih"].T                                   # (H, 3H)
    wihc = w_ih_t[:CHAR_REP, :]                            # (C_out, 3H) char half of Wih^T
    wihw = w_ih_t[CHAR_REP:, :]                            # (W, 3H) word half of Wih^T
    ww = p["word_table"] @ wihw                            # (N_WORDS, 3H) word table folded in
    bih = p["b_ih"][None, :] + p["conv_b"][None, :] @ wihc  # conv bias folded into b_ih
    whh = p["w_hh"].T                                      # (H, 3H)
    bhh = p["b_hh"][None, :]                               # (1, 3H)
    return dict(cw=cw, wihc=wihc, ww=ww, bih=bih, whh=whh, bhh=bhh)


def encode_inputs(char_indexes, word_indexes):
    """Index -> one-hot encodings (pure index arithmetic, no parameters).

    mh:  (S*TP, KH*N_CHARS) multi-hot im2col rows; conv zero-padding = zero
         one-hot entries, rows t>=T duplicate row t=0 (keeps the max-pool exact).
    ohw: (S, N_WORDS) word one-hot.
    """
    S = char_indexes.shape[0]
    t = jnp.arange(TP)
    t_eff = jnp.where(t < T, t, 0)                         # dummy rows copy t=0
    k = jnp.arange(KH)
    src = t_eff[:, None] + k[None, :] - PAD                # (TP, KH) source char row
    valid = (src >= 0) & (src < L)
    src_c = jnp.clip(src, 0, L - 1)
    ci = char_indexes[:, src_c]                            # (S, TP, KH)
    comb = jnp.where(valid[None, :, :], k[None, None, :] * N_CHARS + ci, -1)
    mh = jax.nn.one_hot(comb, KH * N_CHARS, dtype=jnp.float32).sum(axis=2)
    mh = mh.reshape(S * TP, KH * N_CHARS)
    ohw = jax.nn.one_hot(word_indexes, N_WORDS, dtype=jnp.float32)
    return mh, ohw


@jax.jit
def encoder_forward(char_indexes, word_indexes, hidden, packed):
    """Run the EncoderRNN over S words in ONE pallas_call (no grid).

    char_indexes: (S, L) int32; word_indexes: (S,) int32; hidden: (1, 1, H).
    Returns (output, hidden): output = per-step GRU outputs (S, 1, H);
    hidden = final GRU state (1, 1, H).  S = 1 reproduces the original
    module's single-word forward exactly.
    """
    S = char_indexes.shape[0]
    mh, ohw = encode_inputs(char_indexes, word_indexes)
    h0 = hidden.reshape(1, HIDDEN).astype(jnp.float32)

    out = pl.pallas_call(
        encoder_kernel,
        out_shape=jax.ShapeDtypeStruct((S, HIDDEN), jnp.float32),
        scratch_shapes=[pltpu.VMEM((S, CHAR_REP), jnp.float32)],
    )(mh, ohw, packed["cw"], packed["wihc"], packed["ww"], packed["bih"],
      packed["whh"], packed["bhh"], h0)

    output = out.reshape(S, 1, HIDDEN)
    hidden_out = out[S - 1].reshape(1, 1, HIDDEN)
    return output, hidden_out


def reference_forward(char_indexes, word_indexes, hidden, p):
    """Pure-JAX reference matching the PyTorch module, stepped over the sequence."""
    h = hidden.reshape(1, HIDDEN)
    outs = []
    for s in range(char_indexes.shape[0]):
        ce = p["char_table"][char_indexes[s]]                        # (L, E)
        xpad = jnp.pad(ce, ((PAD, PAD), (0, 0)))                     # (L+2P, E)
        acc = jnp.zeros((T, CHAR_REP), jnp.float32)
        for k in range(KH):
            acc = acc + xpad[k:k + T] @ p["conv_w"][:, 0, k, :].T
        acc = acc + p["conv_b"][None, :]
        char_rep = jnp.max(acc, axis=0, keepdims=True)
        wemb = p["word_table"][word_indexes[s]].reshape(1, WORD_EMB_DIM)
        x = jnp.concatenate([char_rep, wemb], axis=1)
        gi = x @ p["w_ih"].T + p["b_ih"]
        gh = h @ p["w_hh"].T + p["b_hh"]
        r = jax.nn.sigmoid(gi[:, :HIDDEN] + gh[:, :HIDDEN])
        z = jax.nn.sigmoid(gi[:, HIDDEN:2 * HIDDEN] + gh[:, HIDDEN:2 * HIDDEN])
        n = jnp.tanh(gi[:, 2 * HIDDEN:] + r * gh[:, 2 * HIDDEN:])
        h = (1.0 - z) * n + z * h
        outs.append(h)
    return jnp.stack(outs, axis=0), h.reshape(1, 1, HIDDEN)


if __name__ == "__main__":
    key = jax.random.PRNGKey(0)
    pkey, ikey, wkey = jax.random.split(key, 3)
    raw = make_params(pkey)
    packed = pack_params(raw)          # one-time weight re-layout, outside the hot path

    char_indexes = jax.random.randint(ikey, (SEQ, L), 0, N_CHARS, dtype=jnp.int32)
    word_indexes = jax.random.randint(wkey, (SEQ,), 0, N_WORDS, dtype=jnp.int32)
    hidden = jnp.zeros((1, 1, HIDDEN), jnp.float32)   # initHidden()

    output, hidden_out = encoder_forward(char_indexes, word_indexes, hidden, packed)
    output = jax.block_until_ready(output)
    hidden_out = jax.block_until_ready(hidden_out)

    assert output.shape == (SEQ, 1, HIDDEN)
    assert hidden_out.shape == (1, 1, HIDDEN)
    assert bool(jnp.all(jnp.isfinite(output)))

    ref_out, ref_h = reference_forward(char_indexes, word_indexes, hidden, raw)
    max_err = float(jnp.max(jnp.abs(output - ref_out)))
    assert max_err < 1e-4, f"kernel mismatch vs reference: {max_err}"
    assert float(jnp.max(jnp.abs(hidden_out - ref_h))) < 1e-4

    print("KERNEL_OK")
</pallas_src>

<mosaic_0001>
module attributes {stable_mosaic.version = 11 : i64} {
  func.func @encoder_kernel(%arg0: memref<128x90xf32, #tpu.memory_space<vmem>>, %arg1: memref<8x50xf32, #tpu.memory_space<vmem>>, %arg2: memref<90x25xf32, #tpu.memory_space<vmem>>, %arg3: memref<25x96xf32, #tpu.memory_space<vmem>>, %arg4: memref<50x96xf32, #tpu.memory_space<vmem>>, %arg5: memref<1x96xf32, #tpu.memory_space<vmem>>, %arg6: memref<32x96xf32, #tpu.memory_space<vmem>>, %arg7: memref<1x96xf32, #tpu.memory_space<vmem>>, %arg8: memref<1x32xf32, #tpu.memory_space<vmem>>, %arg9: memref<8x32xf32, #tpu.memory_space<vmem>>, %arg10: memref<8x25xf32, #tpu.memory_space<vmem>>) attributes {dimension_semantics = [], scalar_prefetch = 0 : i64, scratch_operands = 1 : i64, tpu.core_type = #tpu.core_type<tc>} {
    %c0 = arith.constant 0 : index
    %c0_0 = arith.constant 0 : index
    %0 = vector.load %arg0[%c0, %c0_0] : memref<128x90xf32, #tpu.memory_space<vmem>>, vector<128x90xf32>
    %c0_1 = arith.constant 0 : index
    %c0_2 = arith.constant 0 : index
    %1 = vector.load %arg2[%c0_1, %c0_2] : memref<90x25xf32, #tpu.memory_space<vmem>>, vector<90x25xf32>
    %cst = arith.constant dense<0.000000e+00> : vector<128x25xf32>
    %2 = tpu.matmul %0, %1, %cst {dimension_numbers = #tpu.dot_dimension_numbers<[1], [0], [0], [1], [0, 0, 1, 1], [], []>} : vector<128x90xf32>, vector<90x25xf32>, vector<128x25xf32> -> vector<128x25xf32>
    %3 = vector.extract_strided_slice %2 {offsets = [0, 0], sizes = [16, 25], strides = [1, 1]} : vector<128x25xf32> to vector<16x25xf32>
    %cst_3 = arith.constant dense<0xFF800000> : vector<25xf32>
    %4 = vector.multi_reduction <maximumf>, %3, %cst_3 [0] : vector<16x25xf32> to vector<25xf32>
    %5 = vector.shape_cast %4 : vector<25xf32> to vector<1x25xf32>
    %c0_4 = arith.constant 0 : index
    %c0_5 = arith.constant 0 : index
    %6 = vector.load %arg10[%c0_4, %c0_5] : memref<8x25xf32, #tpu.memory_space<vmem>>, vector<1x25xf32>
    tpu.vector_store %arg10[%c0_4, %c0_5], %5 {strides = array<i32>} : memref<8x25xf32, #tpu.memory_space<vmem>>, vector<1x25xf32>,
    %7 = vector.extract_strided_slice %2 {offsets = [16, 0], sizes = [16, 25], strides = [1, 1]} : vector<128x25xf32> to vector<16x25xf32>
    %cst_6 = arith.constant dense<0xFF800000> : vector<25xf32>
    %8 = vector.multi_reduction <maximumf>, %7, %cst_6 [0] : vector<16x25xf32> to vector<25xf32>
    %9 = vector.shape_cast %8 : vector<25xf32> to vector<1x25xf32>
    %c1 = arith.constant 1 : index
    %c0_7 = arith.constant 0 : index
    %10 = vector.load %arg10[%c1, %c0_7] : memref<8x25xf32, #tpu.memory_space<vmem>>, vector<1x25xf32>
    tpu.vector_store %arg10[%c1, %c0_7], %9 {strides = array<i32>} : memref<8x25xf32, #tpu.memory_space<vmem>>, vector<1x25xf32>,
    %11 = vector.extract_strided_slice %2 {offsets = [32, 0], sizes = [16, 25], strides = [1, 1]} : vector<128x25xf32> to vector<16x25xf32>
    %cst_8 = arith.constant dense<0xFF800000> : vector<25xf32>
    %12 = vector.multi_reduction <maximumf>, %11, %cst_8 [0] : vector<16x25xf32> to vector<25xf32>
    %13 = vector.shape_cast %12 : vector<25xf32> to vector<1x25xf32>
    %c2 = arith.constant 2 : index
    %c0_9 = arith.constant 0 : index
    %14 = vector.load %arg10[%c2, %c0_9] : memref<8x25xf32, #tpu.memory_space<vmem>>, vector<1x25xf32>
    tpu.vector_store %arg10[%c2, %c0_9], %13 {strides = array<i32>} : memref<8x25xf32, #tpu.memory_space<vmem>>, vector<1x25xf32>,
    %15 = vector.extract_strided_slice %2 {offsets = [48, 0], sizes = [16, 25], strides = [1, 1]} : vector<128x25xf32> to vector<16x25xf32>
    %cst_10 = arith.constant dense<0xFF800000> : vector<25xf32>
    %16 = vector.multi_reduction <maximumf>, %15, %cst_10 [0] : vector<16x25xf32> to vector<25xf32>
    %17 = vector.shape_cast %16 : vector<25xf32> to vector<1x25xf32>
    %c3 = arith.constant 3 : index
    %c0_11 = arith.constant 0 : index
    %18 = vector.load %arg10[%c3, %c0_11] : memref<8x25xf32, #tpu.memory_space<vmem>>, vector<1x25xf32>
    tpu.vector_store %arg10[%c3, %c0_11], %17 {strides = array<i32>} : memref<8x25xf32, #tpu.memory_space<vmem>>, vector<1x25xf32>,
    %19 = vector.extract_strided_slice %2 {offsets = [64, 0], sizes = [16, 25], strides = [1, 1]} : vector<128x25xf32> to vector<16x25xf32>
    %cst_12 = arith.constant dense<0xFF800000> : vector<25xf32>
    %20 = vector.multi_reduction <maximumf>, %19, %cst_12 [0] : vector<16x25xf32> to vector<25xf32>
    %21 = vector.shape_cast %20 : vector<25xf32> to vector<1x25xf32>
    %c4 = arith.constant 4 : index
    %c0_13 = arith.constant 0 : index
    %22 = vector.load %arg10[%c4, %c0_13] : memref<8x25xf32, #tpu.memory_space<vmem>>, vector<1x25xf32>
    tpu.vector_store %arg10[%c4, %c0_13], %21 {strides = array<i32>} : memref<8x25xf32, #tpu.memory_space<vmem>>, vector<1x25xf32>,
    %23 = vector.extract_strided_slice %2 {offsets = [80, 0], sizes = [16, 25], strides = [1, 1]} : vector<128x25xf32> to vector<16x25xf32>
    %cst_14 = arith.constant dense<0xFF800000> : vector<25xf32>
    %24 = vector.multi_reduction <maximumf>, %23, %cst_14 [0] : vector<16x25xf32> to vector<25xf32>
    %25 = vector.shape_cast %24 : vector<25xf32> to vector<1x25xf32>
    %c5 = arith.constant 5 : index
    %c0_15 = arith.constant 0 : index
    %26 = vector.load %arg10[%c5, %c0_15] : memref<8x25xf32, #tpu.memory_space<vmem>>, vector<1x25xf32>
    tpu.vector_store %arg10[%c5, %c0_15], %25 {strides = array<i32>} : memref<8x25xf32, #tpu.memory_space<vmem>>, vector<1x25xf32>,
    %27 = vector.extract_strided_slice %2 {offsets = [96, 0], sizes = [16, 25], strides = [1, 1]} : vector<128x25xf32> to vector<16x25xf32>
    %cst_16 = arith.constant dense<0xFF800000> : vector<25xf32>
    %28 = vector.multi_reduction <maximumf>, %27, %cst_16 [0] : vector<16x25xf32> to vector<25xf32>
    %29 = vector.shape_cast %28 : vector<25xf32> to vector<1x25xf32>
    %c6 = arith.constant 6 : index
    %c0_17 = arith.constant 0 : index
    %30 = vector.load %arg10[%c6, %c0_17] : memref<8x25xf32, #tpu.memory_space<vmem>>, vector<1x25xf32>
    tpu.vector_store %arg10[%c6, %c0_17], %29 {strides = array<i32>} : memref<8x25xf32, #tpu.memory_space<vmem>>, vector<1x25xf32>,
    %31 = vector.extract_strided_slice %2 {offsets = [112, 0], sizes = [16, 25], strides = [1, 1]} : vector<128x25xf32> to vector<16x25xf32>
    %cst_18 = arith.constant dense<0xFF800000> : vector<25xf32>
    %32 = vector.multi_reduction <maximumf>, %31, %cst_18 [0] : vector<16x25xf32> to vector<25xf32>
    %33 = vector.shape_cast %32 : vector<25xf32> to vector<1x25xf32>
    %c7 = arith.constant 7 : index
    %c0_19 = arith.constant 0 : index
    %34 = vector.load %arg10[%c7, %c0_19] : memref<8x25xf32, #tpu.memory_space<vmem>>, vector<1x25xf32>
    tpu.vector_store %arg10[%c7, %c0_19], %33 {strides = array<i32>} : memref<8x25xf32, #tpu.memory_space<vmem>>, vector<1x25xf32>,
    %c0_20 = arith.constant 0 : index
    %c0_21 = arith.constant 0 : index
    %35 = vector.load %arg10[%c0_20, %c0_21] : memref<8x25xf32, #tpu.memory_space<vmem>>, vector<8x25xf32>
    %c0_22 = arith.constant 0 : index
    %c0_23 = arith.constant 0 : index
    %36 = vector.load %arg3[%c0_22, %c0_23] : memref<25x96xf32, #tpu.memory_space<vmem>>, vector<25x96xf32>
    %cst_24 = arith.constant dense<0.000000e+00> : vector<8x96xf32>
    %37 = tpu.matmul %35, %36, %cst_24 {dimension_numbers = #tpu.dot_dimension_numbers<[1], [0], [0], [1], [0, 0, 1, 1], [], []>} : vector<8x25xf32>, vector<25x96xf32>, vector<8x96xf32> -> vector<8x96xf32>
    %c0_25 = arith.constant 0 : index
    %c0_26 = arith.constant 0 : index
    %38 = vector.load %arg1[%c0_25, %c0_26] : memref<8x50xf32, #tpu.memory_space<vmem>>, vector<8x50xf32>
    %c0_27 = arith.constant 0 : index
    %c0_28 = arith.constant 0 : index
    %39 = vector.load %arg4[%c0_27, %c0_28] : memref<50x96xf32, #tpu.memory_space<vmem>>, vector<50x96xf32>
    %cst_29 = arith.constant dense<0.000000e+00> : vector<8x96xf32>
    %40 = tpu.matmul %38, %39, %cst_29 {dimension_numbers = #tpu.dot_dimension_numbers<[1], [0], [0], [1], [0, 0, 1, 1], [], []>} : vector<8x50xf32>, vector<50x96xf32>, vector<8x96xf32> -> vector<8x96xf32>
    %41 = arith.addf %37, %40 : vector<8x96xf32>
    %c0_30 = arith.constant 0 : index
    %c0_31 = arith.constant 0 : index
    %42 = vector.load %arg5[%c0_30, %c0_31] : memref<1x96xf32, #tpu.memory_space<vmem>>, vector<1x96xf32>
    %43 = vector.broadcast %42 : vector<1x96xf32> to vector<8x96xf32>
    %44 = arith.addf %41, %43 : vector<8x96xf32>
    %c0_32 = arith.constant 0 : index
    %c0_33 = arith.constant 0 : index
    %45 = vector.load %arg6[%c0_32, %c0_33] : memref<32x96xf32, #tpu.memory_space<vmem>>, vector<32x96xf32>
    %c0_34 = arith.constant 0 : index
    %c0_35 = arith.constant 0 : index
    %46 = vector.load %arg7[%c0_34, %c0_35] : memref<1x96xf32, #tpu.memory_space<vmem>>, vector<1x96xf32>
    %c0_36 = arith.constant 0 : index
    %c0_37 = arith.constant 0 : index
    %47 = vector.load %arg8[%c0_36, %c0_37] : memref<1x32xf32, #tpu.memory_space<vmem>>, vector<1x32xf32>
    %cst_38 = arith.constant dense<0.000000e+00> : vector<1x96xf32>
    %48 = tpu.matmul %47, %45, %cst_38 {dimension_numbers = #tpu.dot_dimension_numbers<[1], [0], [0], [1], [0, 0, 1, 1], [], []>} : vector<1x32xf32>, vector<32x96xf32>, vector<1x96xf32> -> vector<1x96xf32>
    %49 = arith.addf %48, %46 : vector<1x96xf32>
    %50 = vector.extract_strided_slice %44 {offsets = [0, 0], sizes = [1, 96], strides = [1, 1]} : vector<8x96xf32> to vector<1x96xf32>
    %51 = vector.extract_strided_slice %50 {offsets = [0, 0], sizes = [1, 32], strides = [1, 1]} : vector<1x96xf32> to vector<1x32xf32>
    %52 = vector.extract_strided_slice %49 {offsets = [0, 0], sizes = [1, 32], strides = [1, 1]} : vector<1x96xf32> to vector<1x32xf32>
    %53 = arith.addf %51, %52 : vector<1x32xf32>
    %54 = arith.negf %53 : vector<1x32xf32>
    %55 = math.exp %54 : vector<1x32xf32>
    %cst_39 = arith.constant 1.000000e+00 : f32
    %56 = vector.broadcast %cst_39 : f32 to vector<1x32xf32>
    %57 = arith.addf %56, %55 : vector<1x32xf32>
    %58 = arith.divf %56, %57 : vector<1x32xf32>
    %59 = vector.extract_strided_slice %50 {offsets = [0, 32], sizes = [1, 32], strides = [1, 1]} : vector<1x96xf32> to vector<1x32xf32>
    %60 = vector.extract_strided_slice %49 {offsets = [0, 32], sizes = [1, 32], strides = [1, 1]} : vector<1x96xf32> to vector<1x32xf32>
    %61 = arith.addf %59, %60 : vector<1x32xf32>
    %62 = arith.negf %61 : vector<1x32xf32>
    %63 = math.exp %62 : vector<1x32xf32>
    %cst_40 = arith.constant 1.000000e+00 : f32
    %64 = vector.broadcast %cst_40 : f32 to vector<1x32xf32>
    %65 = arith.addf %64, %63 : vector<1x32xf32>
    %66 = arith.divf %64, %65 : vector<1x32xf32>
    %67 = vector.extract_strided_slice %50 {offsets = [0, 64], sizes = [1, 32], strides = [1, 1]} : vector<1x96xf32> to vector<1x32xf32>
    %68 = vector.extract_strided_slice %49 {offsets = [0, 64], sizes = [1, 32], strides = [1, 1]} : vector<1x96xf32> to vector<1x32xf32>
    %69 = arith.mulf %58, %68 : vector<1x32xf32>
    %70 = arith.addf %67, %69 : vector<1x32xf32>
    %71 = math.tanh %70 : vector<1x32xf32>
    %cst_41 = arith.constant 1.000000e+00 : f32
    %72 = vector.broadcast %cst_41 : f32 to vector<1x32xf32>
    %73 = arith.subf %72, %66 : vector<1x32xf32>
    %74 = arith.mulf %73, %71 : vector<1x32xf32>
    %75 = arith.mulf %66, %47 : vector<1x32xf32>
    %76 = arith.addf %74, %75 : vector<1x32xf32>
    %c0_42 = arith.constant 0 : index
    %c0_43 = arith.constant 0 : index
    %77 = vector.load %arg9[%c0_42, %c0_43] : memref<8x32xf32, #tpu.memory_space<vmem>>, vector<1x32xf32>
    tpu.vector_store %arg9[%c0_42, %c0_43], %76 {strides = array<i32>} : memref<8x32xf32, #tpu.memory_space<vmem>>, vector<1x32xf32>,
    %cst_44 = arith.constant dense<0.000000e+00> : vector<1x96xf32>
    %78 = tpu.matmul %76, %45, %cst_44 {dimension_numbers = #tpu.dot_dimension_numbers<[1], [0], [0], [1], [0, 0, 1, 1], [], []>} : vector<1x32xf32>, vector<32x96xf32>, vector<1x96xf32> -> vector<1x96xf32>
    %79 = arith.addf %78, %46 : vector<1x96xf32>
    %80 = vector.extract_strided_slice %44 {offsets = [1, 0], sizes = [1, 96], strides = [1, 1]} : vector<8x96xf32> to vector<1x96xf32>
    %81 = vector.extract_strided_slice %80 {offsets = [0, 0], sizes = [1, 32], strides = [1, 1]} : vector<1x96xf32> to vector<1x32xf32>
    %82 = vector.extract_strided_slice %79 {offsets = [0, 0], sizes = [1, 32], strides = [1, 1]} : vector<1x96xf32> to vector<1x32xf32>
    %83 = arith.addf %81, %82 : vector<1x32xf32>
    %84 = arith.negf %83 : vector<1x32xf32>
    %85 = math.exp %84 : vector<1x32xf32>
    %cst_45 = arith.constant 1.000000e+00 : f32
    %86 = vector.broadcast %cst_45 : f32 to vector<1x32xf32>
    %87 = arith.addf %86, %85 : vector<1x32xf32>
    %88 = arith.divf %86, %87 : vector<1x32xf32>
    %89 = vector.extract_strided_slice %80 {offsets = [0, 32], sizes = [1, 32], strides = [1, 1]} : vector<1x96xf32> to vector<1x32xf32>
    %90 = vector.extract_strided_slice %79 {offsets = [0, 32], sizes = [1, 32], strides = [1, 1]} : vector<1x96xf32> to vector<1x32xf32>
    %91 = arith.addf %89, %90 : vector<1x32xf32>
    %92 = arith.negf %91 : vector<1x32xf32>
    %93 = math.exp %92 : vector<1x32xf32>
    %cst_46 = arith.constant 1.000000e+00 : f32
    %94 = vector.broadcast %cst_46 : f32 to vector<1x32xf32>
    %95 = arith.addf %94, %93 : vector<1x32xf32>
    %96 = arith.divf %94, %95 : vector<1x32xf32>
    %97 = vector.extract_strided_slice %80 {offsets = [0, 64], sizes = [1, 32], strides = [1, 1]} : vector<1x96xf32> to vector<1x32xf32>
    %98 = vector.extract_strided_slice %79 {offsets = [0, 64], sizes = [1, 32], strides = [1, 1]} : vector<1x96xf32> to vector<1x32xf32>
    %99 = arith.mulf %88, %98 : vector<1x32xf32>
    %100 = arith.addf %97, %99 : vector<1x32xf32>
    %101 = math.tanh %100 : vector<1x32xf32>
    %cst_47 = arith.constant 1.000000e+00 : f32
    %102 = vector.broadcast %cst_47 : f32 to vector<1x32xf32>
    %103 = arith.subf %102, %96 : vector<1x32xf32>
    %104 = arith.mulf %103, %101 : vector<1x32xf32>
    %105 = arith.mulf %96, %76 : vector<1x32xf32>
    %106 = arith.addf %104, %105 : vector<1x32xf32>
    %c1_48 = arith.constant 1 : index
    %c0_49 = arith.constant 0 : index
    %107 = vector.load %arg9[%c1_48, %c0_49] : memref<8x32xf32, #tpu.memory_space<vmem>>, vector<1x32xf32>
    tpu.vector_store %arg9[%c1_48, %c0_49], %106 {strides = array<i32>} : memref<8x32xf32, #tpu.memory_space<vmem>>, vector<1x32xf32>,
    %cst_50 = arith.constant dense<0.000000e+00> : vector<1x96xf32>
    %108 = tpu.matmul %106, %45, %cst_50 {dimension_numbers = #tpu.dot_dimension_numbers<[1], [0], [0], [1], [0, 0, 1, 1], [], []>} : vector<1x32xf32>, vector<32x96xf32>, vector<1x96xf32> -> vector<1x96xf32>
    %109 = arith.addf %108, %46 : vector<1x96xf32>
    %110 = vector.extract_strided_slice %44 {offsets = [2, 0], sizes = [1, 96], strides = [1, 1]} : vector<8x96xf32> to vector<1x96xf32>
    %111 = vector.extract_strided_slice %110 {offsets = [0, 0], sizes = [1, 32], strides = [1, 1]} : vector<1x96xf32> to vector<1x32xf32>
    %112 = vector.extract_strided_slice %109 {offsets = [0, 0], sizes = [1, 32], strides = [1, 1]} : vector<1x96xf32> to vector<1x32xf32>
    %113 = arith.addf %111, %112 : vector<1x32xf32>
    %114 = arith.negf %113 : vector<1x32xf32>
    %115 = math.exp %114 : vector<1x32xf32>
    %cst_51 = arith.constant 1.000000e+00 : f32
    %116 = vector.broadcast %cst_51 : f32 to vector<1x32xf32>
    %117 = arith.addf %116, %115 : vector<1x32xf32>
    %118 = arith.divf %116, %117 : vector<1x32xf32>
    %119 = vector.extract_strided_slice %110 {offsets = [0, 32], sizes = [1, 32], strides = [1, 1]} : vector<1x96xf32> to vector<1x32xf32>
    %120 = vector.extract_strided_slice %109 {offsets = [0, 32], sizes = [1, 32], strides = [1, 1]} : vector<1x96xf32> to vector<1x32xf32>
    %121 = arith.addf %119, %120 : vector<1x32xf32>
    %122 = arith.negf %121 : vector<1x32xf32>
    %123 = math.exp %122 : vector<1x32xf32>
    %cst_52 = arith.constant 1.000000e+00 : f32
    %124 = vector.broadcast %cst_52 : f32 to vector<1x32xf32>
    %125 = arith.addf %124, %123 : vector<1x32xf32>
    %126 = arith.divf %124, %125 : vector<1x32xf32>
    %127 = vector.extract_strided_slice %110 {offsets = [0, 64], sizes = [1, 32], strides = [1, 1]} : vector<1x96xf32> to vector<1x32xf32>
    %128 = vector.extract_strided_slice %109 {offsets = [0, 64], sizes = [1, 32], strides = [1, 1]} : vector<1x96xf32> to vector<1x32xf32>
    %129 = arith.mulf %118, %128 : vector<1x32xf32>
    %130 = arith.addf %127, %129 : vector<1x32xf32>
    %131 = math.tanh %130 : vector<1x32xf32>
    %cst_53 = arith.constant 1.000000e+00 : f32
    %132 = vector.broadcast %cst_53 : f32 to vector<1x32xf32>
    %133 = arith.subf %132, %126 : vector<1x32xf32>
    %134 = arith.mulf %133, %131 : vector<1x32xf32>
    %135 = arith.mulf %126, %106 : vector<1x32xf32>
    %136 = arith.addf %134, %135 : vector<1x32xf32>
    %c2_54 = arith.constant 2 : index
    %c0_55 = arith.constant 0 : index
    %137 = vector.load %arg9[%c2_54, %c0_55] : memref<8x32xf32, #tpu.memory_space<vmem>>, vector<1x32xf32>
    tpu.vector_store %arg9[%c2_54, %c0_55], %136 {strides = array<i32>} : memref<8x32xf32, #tpu.memory_space<vmem>>, vector<1x32xf32>,
    %cst_56 = arith.constant dense<0.000000e+00> : vector<1x96xf32>
    %138 = tpu.matmul %136, %45, %cst_56 {dimension_numbers = #tpu.dot_dimension_numbers<[1], [0], [0], [1], [0, 0, 1, 1], [], []>} : vector<1x32xf32>, vector<32x96xf32>, vector<1x96xf32> -> vector<1x96xf32>
    %139 = arith.addf %138, %46 : vector<1x96xf32>
    %140 = vector.extract_strided_slice %44 {offsets = [3, 0], sizes = [1, 96], strides = [1, 1]} : vector<8x96xf32> to vector<1x96xf32>
    %141 = vector.extract_strided_slice %140 {offsets = [0, 0], sizes = [1, 32], strides = [1, 1]} : vector<1x96xf32> to vector<1x32xf32>
    %142 = vector.extract_strided_slice %139 {offsets = [0, 0], sizes = [1, 32], strides = [1, 1]} : vector<1x96xf32> to vector<1x32xf32>
    %143 = arith.addf %141, %142 : vector<1x32xf32>
    %144 = arith.negf %143 : vector<1x32xf32>
    %145 = math.exp %144 : vector<1x32xf32>
    %cst_57 = arith.constant 1.000000e+00 : f32
    %146 = vector.broadcast %cst_57 : f32 to vector<1x32xf32>
    %147 = arith.addf %146, %145 : vector<1x32xf32>
    %148 = arith.divf %146, %147 : vector<1x32xf32>
    %149 = vector.extract_strided_slice %140 {offsets = [0, 32], sizes = [1, 32], strides = [1, 1]} : vector<1x96xf32> to vector<1x32xf32>
    %150 = vector.extract_strided_slice %139 {offsets = [0, 32], sizes = [1, 32], strides = [1, 1]} : vector<1x96xf32> to vector<1x32xf32>
    %151 = arith.addf %149, %150 : vector<1x32xf32>
    %152 = arith.negf %151 : vector<1x32xf32>
    %153 = math.exp %152 : vector<1x32xf32>
    %cst_58 = arith.constant 1.000000e+00 : f32
    %154 = vector.broadcast %cst_58 : f32 to vector<1x32xf32>
    %155 = arith.addf %154, %153 : vector<1x32xf32>
    %156 = arith.divf %154, %155 : vector<1x32xf32>
    %157 = vector.extract_strided_slice %140 {offsets = [0, 64], sizes = [1, 32], strides = [1, 1]} : vector<1x96xf32> to vector<1x32xf32>
    %158 = vector.extract_strided_slice %139 {offsets = [0, 64], sizes = [1, 32], strides = [1, 1]} : vector<1x96xf32> to vector<1x32xf32>
    %159 = arith.mulf %148, %158 : vector<1x32xf32>
    %160 = arith.addf %157, %159 : vector<1x32xf32>
    %161 = math.tanh %160 : vector<1x32xf32>
    %cst_59 = arith.constant 1.000000e+00 : f32
    %162 = vector.broadcast %cst_59 : f32 to vector<1x32xf32>
    %163 = arith.subf %162, %156 : vector<1x32xf32>
    %164 = arith.mulf %163, %161 : vector<1x32xf32>
    %165 = arith.mulf %156, %136 : vector<1x32xf32>
    %166 = arith.addf %164, %165 : vector<1x32xf32>
    %c3_60 = arith.constant 3 : index
    %c0_61 = arith.constant 0 : index
    %167 = vector.load %arg9[%c3_60, %c0_61] : memref<8x32xf32, #tpu.memory_space<vmem>>, vector<1x32xf32>
    tpu.vector_store %arg9[%c3_60, %c0_61], %166 {strides = array<i32>} : memref<8x32xf32, #tpu.memory_space<vmem>>, vector<1x32xf32>,
    %cst_62 = arith.constant dense<0.000000e+00> : vector<1x96xf32>
    %168 = tpu.matmul %166, %45, %cst_62 {dimension_numbers = #tpu.dot_dimension_numbers<[1], [0], [0], [1], [0, 0, 1, 1], [], []>} : vector<1x32xf32>, vector<32x96xf32>, vector<1x96xf32> -> vector<1x96xf32>
    %169 = arith.addf %168, %46 : vector<1x96xf32>
    %170 = vector.extract_strided_slice %44 {offsets = [4, 0], sizes = [1, 96], strides = [1, 1]} : vector<8x96xf32> to vector<1x96xf32>
    %171 = vector.extract_strided_slice %170 {offsets = [0, 0], sizes = [1, 32], strides = [1, 1]} : vector<1x96xf32> to vector<1x32xf32>
    %172 = vector.extract_strided_slice %169 {offsets = [0, 0], sizes = [1, 32], strides = [1, 1]} : vector<1x96xf32> to vector<1x32xf32>
    %173 = arith.addf %171, %172 : vector<1x32xf32>
    %174 = arith.negf %173 : vector<1x32xf32>
    %175 = math.exp %174 : vector<1x32xf32>
    %cst_63 = arith.constant 1.000000e+00 : f32
    %176 = vector.broadcast %cst_63 : f32 to vector<1x32xf32>
    %177 = arith.addf %176, %175 : vector<1x32xf32>
    %178 = arith.divf %176, %177 : vector<1x32xf32>
    %179 = vector.extract_strided_slice %170 {offsets = [0, 32], sizes = [1, 32], strides = [1, 1]} : vector<1x96xf32> to vector<1x32xf32>
    %180 = vector.extract_strided_slice %169 {offsets = [0, 32], sizes = [1, 32], strides = [1, 1]} : vector<1x96xf32> to vector<1x32xf32>
    %181 = arith.addf %179, %180 : vector<1x32xf32>
    %182 = arith.negf %181 : vector<1x32xf32>
    %183 = math.exp %182 : vector<1x32xf32>
    %cst_64 = arith.constant 1.000000e+00 : f32
    %184 = vector.broadcast %cst_64 : f32 to vector<1x32xf32>
    %185 = arith.addf %184, %183 : vector<1x32xf32>
    %186 = arith.divf %184, %185 : vector<1x32xf32>
    %187 = vector.extract_strided_slice %170 {offsets = [0, 64], sizes = [1, 32], strides = [1, 1]} : vector<1x96xf32> to vector<1x32xf32>
    %188 = vector.extract_strided_slice %169 {offsets = [0, 64], sizes = [1, 32], strides = [1, 1]} : vector<1x96xf32> to vector<1x32xf32>
    %189 = arith.mulf %178, %188 : vector<1x32xf32>
    %190 = arith.addf %187, %189 : vector<1x32xf32>
    %191 = math.tanh %190 : vector<1x32xf32>
    %cst_65 = arith.constant 1.000000e+00 : f32
    %192 = vector.broadcast %cst_65 : f32 to vector<1x32xf32>
    %193 = arith.subf %192, %186 : vector<1x32xf32>
    %194 = arith.mulf %193, %191 : vector<1x32xf32>
    %195 = arith.mulf %186, %166 : vector<1x32xf32>
    %196 = arith.addf %194, %195 : vector<1x32xf32>
    %c4_66 = arith.constant 4 : index
    %c0_67 = arith.constant 0 : index
    %197 = vector.load %arg9[%c4_66, %c0_67] : memref<8x32xf32, #tpu.memory_space<vmem>>, vector<1x32xf32>
    tpu.vector_store %arg9[%c4_66, %c0_67], %196 {strides = array<i32>} : memref<8x32xf32, #tpu.memory_space<vmem>>, vector<1x32xf32>,
    %cst_68 = arith.constant dense<0.000000e+00> : vector<1x96xf32>
    %198 = tpu.matmul %196, %45, %cst_68 {dimension_numbers = #tpu.dot_dimension_numbers<[1], [0], [0], [1], [0, 0, 1, 1], [], []>} : vector<1x32xf32>, vector<32x96xf32>, vector<1x96xf32> -> vector<1x96xf32>
    %199 = arith.addf %198, %46 : vector<1x96xf32>
    %200 = vector.extract_strided_slice %44 {offsets = [5, 0], sizes = [1, 96], strides = [1, 1]} : vector<8x96xf32> to vector<1x96xf32>
    %201 = vector.extract_strided_slice %200 {offsets = [0, 0], sizes = [1, 32], strides = [1, 1]} : vector<1x96xf32> to vector<1x32xf32>
    %202 = vector.extract_strided_slice %199 {offsets = [0, 0], sizes = [1, 32], strides = [1, 1]} : vector<1x96xf32> to vector<1x32xf32>
    %203 = arith.addf %201, %202 : vector<1x32xf32>
    %204 = arith.negf %203 : vector<1x32xf32>
    %205 = math.exp %204 : vector<1x32xf32>
    %cst_69 = arith.constant 1.000000e+00 : f32
    %206 = vector.broadcast %cst_69 : f32 to vector<1x32xf32>
    %207 = arith.addf %206, %205 : vector<1x32xf32>
    %208 = arith.divf %206, %207 : vector<1x32xf32>
    %209 = vector.extract_strided_slice %200 {offsets = [0, 32], sizes = [1, 32], strides = [1, 1]} : vector<1x96xf32> to vector<1x32xf32>
    %210 = vector.extract_strided_slice %199 {offsets = [0, 32], sizes = [1, 32], strides = [1, 1]} : vector<1x96xf32> to vector<1x32xf32>
    %211 = arith.addf %209, %210 : vector<1x32xf32>
    %212 = arith.negf %211 : vector<1x32xf32>
    %213 = math.exp %212 : vector<1x32xf32>
    %cst_70 = arith.constant 1.000000e+00 : f32
    %214 = vector.broadcast %cst_70 : f32 to vector<1x32xf32>
    %215 = arith.addf %214, %213 : vector<1x32xf32>
    %216 = arith.divf %214, %215 : vector<1x32xf32>
    %217 = vector.extract_strided_slice %200 {offsets = [0, 64], sizes = [1, 32], strides = [1, 1]} : vector<1x96xf32> to vector<1x32xf32>
    %218 = vector.extract_strided_slice %199 {offsets = [0, 64], sizes = [1, 32], strides = [1, 1]} : vector<1x96xf32> to vector<1x32xf32>
    %219 = arith.mulf %208, %218 : vector<1x32xf32>
    %220 = arith.addf %217, %219 : vector<1x32xf32>
    %221 = math.tanh %220 : vector<1x32xf32>
    %cst_71 = arith.constant 1.000000e+00 : f32
    %222 = vector.broadcast %cst_71 : f32 to vector<1x32xf32>
    %223 = arith.subf %222, %216 : vector<1x32xf32>
    %224 = arith.mulf %223, %221 : vector<1x32xf32>
    %225 = arith.mulf %216, %196 : vector<1x32xf32>
    %226 = arith.addf %224, %225 : vector<1x32xf32>
    %c5_72 = arith.constant 5 : index
    %c0_73 = arith.constant 0 : index
    %227 = vector.load %arg9[%c5_72, %c0_73] : memref<8x32xf32, #tpu.memory_space<vmem>>, vector<1x32xf32>
    tpu.vector_store %arg9[%c5_72, %c0_73], %226 {strides = array<i32>} : memref<8x32xf32, #tpu.memory_space<vmem>>, vector<1x32xf32>,
    %cst_74 = arith.constant dense<0.000000e+00> : vector<1x96xf32>
    %228 = tpu.matmul %226, %45, %cst_74 {dimension_numbers = #tpu.dot_dimension_numbers<[1], [0], [0], [1], [0, 0, 1, 1], [], []>} : vector<1x32xf32>, vector<32x96xf32>, vector<1x96xf32> -> vector<1x96xf32>
    %229 = arith.addf %228, %46 : vector<1x96xf32>
    %230 = vector.extract_strided_slice %44 {offsets = [6, 0], sizes = [1, 96], strides = [1, 1]} : vector<8x96xf32> to vector<1x96xf32>
    %231 = vector.extract_strided_slice %230 {offsets = [0, 0], sizes = [1, 32], strides = [1, 1]} : vector<1x96xf32> to vector<1x32xf32>
    %232 = vector.extract_strided_slice %229 {offsets = [0, 0], sizes = [1, 32], strides = [1, 1]} : vector<1x96xf32> to vector<1x32xf32>
    %233 = arith.addf %231, %232 : vector<1x32xf32>
    %234 = arith.negf %233 : vector<1x32xf32>
    %235 = math.exp %234 : vector<1x32xf32>
    %cst_75 = arith.constant 1.000000e+00 : f32
    %236 = vector.broadcast %cst_75 : f32 to vector<1x32xf32>
    %237 = arith.addf %236, %235 : vector<1x32xf32>
    %238 = arith.divf %236, %237 : vector<1x32xf32>
    %239 = vector.extract_strided_slice %230 {offsets = [0, 32], sizes = [1, 32], strides = [1, 1]} : vector<1x96xf32> to vector<1x32xf32>
    %240 = vector.extract_strided_slice %229 {offsets = [0, 32], sizes = [1, 32], strides = [1, 1]} : vector<1x96xf32> to vector<1x32xf32>
    %241 = arith.addf %239, %240 : vector<1x32xf32>
    %242 = arith.negf %241 : vector<1x32xf32>
    %243 = math.exp %242 : vector<1x32xf32>
    %cst_76 = arith.constant 1.000000e+00 : f32
    %244 = vector.broadcast %cst_76 : f32 to vector<1x32xf32>
    %245 = arith.addf %244, %243 : vector<1x32xf32>
    %246 = arith.divf %244, %245 : vector<1x32xf32>
    %247 = vector.extract_strided_slice %230 {offsets = [0, 64], sizes = [1, 32], strides = [1, 1]} : vector<1x96xf32> to vector<1x32xf32>
    %248 = vector.extract_strided_slice %229 {offsets = [0, 64], sizes = [1, 32], strides = [1, 1]} : vector<1x96xf32> to vector<1x32xf32>
    %249 = arith.mulf %238, %248 : vector<1x32xf32>
    %250 = arith.addf %247, %249 : vector<1x32xf32>
    %251 = math.tanh %250 : vector<1x32xf32>
    %cst_77 = arith.constant 1.000000e+00 : f32
    %252 = vector.broadcast %cst_77 : f32 to vector<1x32xf32>
    %253 = arith.subf %252, %246 : vector<1x32xf32>
    %254 = arith.mulf %253, %251 : vector<1x32xf32>
    %255 = arith.mulf %246, %226 : vector<1x32xf32>
    %256 = arith.addf %254, %255 : vector<1x32xf32>
    %c6_78 = arith.constant 6 : index
    %c0_79 = arith.constant 0 : index
    %257 = vector.load %arg9[%c6_78, %c0_79] : memref<8x32xf32, #tpu.memory_space<vmem>>, vector<1x32xf32>
    tpu.vector_store %arg9[%c6_78, %c0_79], %256 {strides = array<i32>} : memref<8x32xf32, #tpu.memory_space<vmem>>, vector<1x32xf32>,
    %cst_80 = arith.constant dense<0.000000e+00> : vector<1x96xf32>
    %258 = tpu.matmul %256, %45, %cst_80 {dimension_numbers = #tpu.dot_dimension_numbers<[1], [0], [0], [1], [0, 0, 1, 1], [], []>} : vector<1x32xf32>, vector<32x96xf32>, vector<1x96xf32> -> vector<1x96xf32>
    %259 = arith.addf %258, %46 : vector<1x96xf32>
    %260 = vector.extract_strided_slice %44 {offsets = [7, 0], sizes = [1, 96], strides = [1, 1]} : vector<8x96xf32> to vector<1x96xf32>
    %261 = vector.extract_strided_slice %260 {offsets = [0, 0], sizes = [1, 32], strides = [1, 1]} : vector<1x96xf32> to vector<1x32xf32>
    %262 = vector.extract_strided_slice %259 {offsets = [0, 0], sizes = [1, 32], strides = [1, 1]} : vector<1x96xf32> to vector<1x32xf32>
    %263 = arith.addf %261, %262 : vector<1x32xf32>
    %264 = arith.negf %263 : vector<1x32xf32>
    %265 = math.exp %264 : vector<1x32xf32>
    %cst_81 = arith.constant 1.000000e+00 : f32
    %266 = vector.broadcast %cst_81 : f32 to vector<1x32xf32>
    %267 = arith.addf %266, %265 : vector<1x32xf32>
    %268 = arith.divf %266, %267 : vector<1x32xf32>
    %269 = vector.extract_strided_slice %260 {offsets = [0, 32], sizes = [1, 32], strides = [1, 1]} : vector<1x96xf32> to vector<1x32xf32>
    %270 = vector.extract_strided_slice %259 {offsets = [0, 32], sizes = [1, 32], strides = [1, 1]} : vector<1x96xf32> to vector<1x32xf32>
    %271 = arith.addf %269, %270 : vector<1x32xf32>
    %272 = arith.negf %271 : vector<1x32xf32>
    %273 = math.exp %272 : vector<1x32xf32>
    %cst_82 = arith.constant 1.000000e+00 : f32
    %274 = vector.broadcast %cst_82 : f32 to vector<1x32xf32>
    %275 = arith.addf %274, %273 : vector<1x32xf32>
    %276 = arith.divf %274, %275 : vector<1x32xf32>
    %277 = vector.extract_strided_slice %260 {offsets = [0, 64], sizes = [1, 32], strides = [1, 1]} : vector<1x96xf32> to vector<1x32xf32>
    %278 = vector.extract_strided_slice %259 {offsets = [0, 64], sizes = [1, 32], strides = [1, 1]} : vector<1x96xf32> to vector<1x32xf32>
    %279 = arith.mulf %268, %278 : vector<1x32xf32>
    %280 = arith.addf %277, %279 : vector<1x32xf32>
    %281 = math.tanh %280 : vector<1x32xf32>
    %cst_83 = arith.constant 1.000000e+00 : f32
    %282 = vector.broadcast %cst_83 : f32 to vector<1x32xf32>
    %283 = arith.subf %282, %276 : vector<1x32xf32>
    %284 = arith.mulf %283, %281 : vector<1x32xf32>
    %285 = arith.mulf %276, %256 : vector<1x32xf32>
    %286 = arith.addf %284, %285 : vector<1x32xf32>
    %c7_84 = arith.constant 7 : index
    %c0_85 = arith.constant 0 : index
    %287 = vector.load %arg9[%c7_84, %c0_85] : memref<8x32xf32, #tpu.memory_space<vmem>>, vector<1x32xf32>
    tpu.vector_store %arg9[%c7_84, %c0_85], %286 {strides = array<i32>} : memref<8x32xf32, #tpu.memory_space<vmem>>, vector<1x32xf32>,
    return
  }
}

</mosaic_0001>

<bundles_post_ra>
// kernel: encoder_forward.1
= control target key start
LH: loop header
LB: loop body
LE: loop exit
PB: predicated region body
PF: predicated region fallthrough
CT: control target
= control target key end

     0   :  { %vm109_vm0 = vcmask 1041408   ;;  %vm60_vm1 = vcmask 736256   ;;  %v1748_v28 = vmov 0.0   ;;  %vm1749_vm2 = vmmov 0   ;;  %s1750_s28 = smov 64   ;;  %s2209_s2 = inlined_call_operand.vmem [shape: f32[90,25], index: 2, kind: input, shape index: {}]   ;;  %s2210_s0 = inlined_call_operand.vmem [shape: f32[128,90], index: 0, kind: input, shape index: {}]   ;;  %s2211_s4 = inlined_call_operand.vmem [shape: f32[50,96], index: 4, kind: input, shape index: {}]   ;;  %s2212_s1 = inlined_call_operand.vmem [shape: f32[8,50], index: 1, kind: input, shape index: {}]   ;;  %s2213_s3 = inlined_call_operand.vmem [shape: f32[25,96], index: 3, kind: input, shape index: {}]   ;;  %s2214_s6 = inlined_call_operand.vmem [shape: f32[32,96], index: 6, kind: input, shape index: {}]   ;;  %s2215_s8 = inlined_call_operand.vmem [shape: f32[1,32], index: 8, kind: input, shape index: {}]   ;;  %s2216_s7 = inlined_call_operand.vmem [shape: f32[1,96], index: 7, kind: input, shape index: {}]   ;;  %s2217_s5 = inlined_call_operand.vmem [shape: f32[1,96], index: 5, kind: input, shape index: {}]   ;;  %s2218_s9 = inlined_call_operand.vmem [shape: f32[8,32], index: 9, kind: output, shape index: {}]  }
   0x1   :  { %v59_v0 = vld [vmem:[%s2209_s2 + $0x58] sm:$0x3]  ;;  %v58_v1 = vld [vmem:[%s2209_s2 + $0x50] sm:$0xff]  ;;  %v57_v2 = vld [vmem:[%s2209_s2 + $0x48] sm:$0xff]  ;;  %1579 = vmatprep.subr.mxu1 %v1748_v28  ;;  %1593 = vmatprep.mubr.msk.f32.mxu1 %vm1749_vm2, %v1748_v28  ;;  %vm353_vm3 = vcmask 408576   ;;  %vm433_vm4 = vcmask 1040384  }
   0x2   :  { %1531 = vmatprep.subr.msk.mxu0 %vm109_vm0, %v59_v0  ;;  %v56_v3 = vld [vmem:[%s2209_s2 + $0x40] sm:$0xff]  ;;  %v55_v5 = vld [vmem:[%s2209_s2 + $0x38] sm:$0xff]  ;;  %v54_v6 = vld [vmem:[%s2209_s2 + $0x30] sm:$0xff]  ;;  %vm258_vm5 = vcmask 203776   ;;  %vm268_vm6 = vcmask 196608   ;;  %vm521_vm7 = vcmask 261120  }
   0x3   :  { %1532 = vmatpush3.msk.msra.mxu0 %vm109_vm0, %v59_v0  ;;  %v32_v4 = vld [vmem:[%s2210_s0] sm:$0xff]  ;;  %v53_v7 = vld [vmem:[%s2209_s2 + $0x28] sm:$0xff]  ;;  %v51_v9 = vld [vmem:[%s2209_s2 + $0x18] sm:$0xff]  ;;  %vm632_vm8 = vcmask 253952   ;;  %vm740_vm9 = vcmask 254977   ;;  %vm962_vm10 = vcmask 257027  }
   0x4   :  { %1533 = vmatprep.subr.mxu0 %v58_v1  ;;  %1555 = vmatprep.mubr.msk.f32.mxu0 %vm60_vm1, %v32_v4  ;;  %v52_v8 = vld [vmem:[%s2209_s2 + $0x20] sm:$0xff]  ;;  %v50_v10 = vld [vmem:[%s2209_s2 + $0x10] sm:$0xff]  ;;  %v49_v11 = vld [vmem:[%s2209_s2 + $0x8] sm:$0xff]  ;;  %vm1184_vm11 = vcmask 259077   ;;  %vm851_vm12 = vcmask 256002   ;;  %vm1073_vm13 = vcmask 258052  }
   0x5   :  { %1534 = vmatpush3.msra.mxu0 %v58_v1  ;;  %v48_v12 = vld [vmem:[%s2209_s2] sm:$0xff]  ;;  %v33_v13 = vld [vmem:[%s2210_s0 + $0x8] sm:$0xff]  ;;  %v34_v14 = vld [vmem:[%s2210_s0 + $0x10] sm:$0xff]  ;;  %vm1295_vm14 = vcmask 260102   ;;  %vm1406_vm15 = vcmask 261127  }
   0x6   :  { %1535 = vmatprep.subr.mxu0 %v57_v2  ;;  %v35_v15 = vld [vmem:[%s2210_s0 + $0x18] sm:$0xff]  ;;  %v36_v16 = vld [vmem:[%s2210_s0 + $0x20] sm:$0xff]  ;;  %v37_v17 = vld [vmem:[%s2210_s0 + $0x28] sm:$0xff] }
   0x7   :  { %1536 = vmatpush3.msra.mxu0 %v57_v2  ;;  %v38_v18 = vld [vmem:[%s2210_s0 + $0x30] sm:$0xff]  ;;  %v39_v19 = vld [vmem:[%s2210_s0 + $0x38] sm:$0xff]  ;;  %v40_v20 = vld [vmem:[%s2210_s0 + $0x40] sm:$0xff] }
   0x8   :  { %1537 = vmatprep.subr.mxu0 %v56_v3  ;;  %v41_v21 = vld [vmem:[%s2210_s0 + $0x48] sm:$0xff]  ;;  %v42_v22 = vld [vmem:[%s2210_s0 + $0x50] sm:$0xff]  ;;  %v43_v23 = vld [vmem:[%s2210_s0 + $0x58] sm:$0xff] }
   0x9   :  { %1538 = vmatpush3.msra.mxu0 %v56_v3  ;;  %v44_v24 = vld [vmem:[%s2210_s0 + $0x60] sm:$0xff]  ;;  %v45_v25 = vld [vmem:[%s2210_s0 + $0x68] sm:$0xff]  ;;  %v46_v26 = vld [vmem:[%s2210_s0 + $0x70] sm:$0xff] }
   0xa   :  { %1539 = vmatprep.subr.mxu0 %v55_v5  ;;  %v47_v27 = vld [vmem:[%s2210_s0 + $0x78] sm:$0xff]  ;;  %v352_v29 = vld [vmem:[%s2211_s4 + $0x30] sm:$0x3]  ;;  %v351_v30 = vld [vmem:[%s2211_s4 + $0x28] sm:$0xff] }
   0xb   :  { %1540 = vmatpush3.msra.mxu0 %v55_v5  ;;  %1580 = vmatpush3.msk.msra.mxu1 %vm109_vm0, %v352_v29  ;;  %v350_v31 = vld [vmem:[%s2211_s4 + $0x20] sm:$0xff]  ;;  %v349_v32 = vld [vmem:[%s2211_s4 + $0x18] sm:$0xff]  ;;  %v348_v33 = vld [vmem:[%s2211_s4 + $0x10] sm:$0xff] }
   0xc   :  { %1541 = vmatprep.subr.mxu0 %v54_v6  ;;  %1581 = vmatprep.subr.mxu1 %v1748_v28  ;;  %v347_v34 = vld [vmem:[%s2211_s4 + $0x8] sm:$0xff]  ;;  %v346_v35 = vld [vmem:[%s2211_s4] sm:$0xff]  ;;  %v344_v37 = vld [vmem:[%s2213_s3 + $0x18] sm:$0x1] }
   0xd   :  { %1542 = vmatpush3.msra.mxu0 %v54_v6  ;;  %1582 = vmatpush3.msra.mxu1 %v351_v30  ;;  %v345_v36 = vld [vmem:[%s2212_s1] sm:$0xff]  ;;  %v343_v38 = vld [vmem:[%s2213_s3 + $0x10] sm:$0xff]  ;;  %v342_v39 = vld [vmem:[%s2213_s3 + $0x8] sm:$0xff] }
   0xe   :  { %1543 = vmatprep.subr.mxu0 %v53_v7  ;;  %1583 = vmatprep.subr.mxu1 %v1748_v28  ;;  %v341_v40 = vld [vmem:[%s2213_s3] sm:$0xff]  ;;  %v1964_v41 = vld [vmem:[%s2214_s6 + $0x18] sm:$0xff]  ;;  %v1971_v42 = vld [vmem:[%s2214_s6 + $0x10] sm:$0xff] }
   0xf   :  { %1544 = vmatpush3.msra.mxu0 %v53_v7  ;;  %1584 = vmatpush3.msra.mxu1 %v350_v31  ;;  %v1977_v43 = vld [vmem:[%s2214_s6 + $0x8] sm:$0xff]  ;;  %v1984_v44 = vld [vmem:[%s2214_s6] sm:$0xff] }
  0x10   :  { %1545 = vmatprep.subr.mxu0 %v52_v8  ;;  %1585 = vmatprep.subr.mxu1 %v1748_v28 }
  0x11   :  { %1546 = vmatpush3.msra.mxu0 %v52_v8  ;;  %1586 = vmatpush3.msra.mxu1 %v349_v32 }
  0x12   :  { %1547 = vmatprep.subr.mxu0 %v51_v9  ;;  %1587 = vmatprep.subr.mxu1 %v1748_v28 }
  0x13   :  { %1548 = vmatpush3.msra.mxu0 %v51_v9  ;;  %1588 = vmatpush3.msra.mxu1 %v348_v33 }
  0x14   :  { %1549 = vmatprep.subr.mxu0 %v50_v10  ;;  %1589 = vmatprep.subr.mxu1 %v1748_v28 }
  0x15   :  { %1550 = vmatpush3.msra.mxu0 %v50_v10  ;;  %1590 = vmatpush3.msra.mxu1 %v347_v34 }
  0x16   :  { %1551 = vmatprep.subr.mxu0 %v49_v11  ;;  %1591 = vmatprep.subr.mxu1 %v1748_v28 }
  0x17   :  { %1552 = vmatpush3.msra.mxu0 %v49_v11  ;;  %1592 = vmatpush3.msra.mxu1 %v346_v35 }
  0x18   :  { %1553 = vmatprep.subr.mxu0 %v48_v12  ;;  %1594 = vmatmul.mubr.msk.f32.vlgmr.msra.gmra.mxu1 %vm353_vm3, %v345_v36 }
  0x19   :  { %1554 = vmatpush3.msra.mxu0 %v48_v12  ;;  %1596 = vmatprep.subr.mxu1 %v1748_v28 }
  0x1a   :  { %1556 = vmatmul.mubr.msk.f32.vlgmr.msra.gmra.mxu0 %vm60_vm1, %v33_v13  ;;  %1651 = vmatprep.subr.mxu0 %v1748_v28 }
  0x1b   :  { %1558 = vmatprep.mubr.msk.f32.mxu0 %vm60_vm1, %v34_v14  ;;  %1604 = vmatprep.mubr.msk.f32.mxu1 %vm1749_vm2, %v1748_v28 }
  0x1c   :  { %1597 = vmatpush3.msk.msra.mxu1 %vm433_vm4, %v344_v37  ;;  %1652 = vmatpush3.msra.mxu0 %v1964_v41 }
  0x1d   :  { %1598 = vmatprep.subr.mxu1 %v1748_v28  ;;  %1653 = vmatprep.subr.mxu0 %v1748_v28 }
  0x1e   :  { %1559 = vmatmul.mubr.msk.f32.gmra.mxu0 %vm60_vm1, %v35_v15  ;;  %1599 = vmatpush3.msra.mxu1 %v343_v38 }
  0x1f   :  { %1561 = vmatprep.mubr.msk.f32.mxu0 %vm60_vm1, %v36_v16  ;;  %1600 = vmatprep.subr.mxu1 %v1748_v28 }
  0x20   :  { %1601 = vmatpush3.msra.mxu1 %v342_v39  ;;  %1654 = vmatpush3.msra.mxu0 %v1971_v42 }
  0x21   :  { %1602 = vmatprep.subr.mxu1 %v1748_v28  ;;  %1655 = vmatprep.subr.mxu0 %v1748_v28 }
  0x22   :  { %1562 = vmatmul.mubr.msk.f32.gmra.mxu0 %vm60_vm1, %v37_v17  ;;  %1603 = vmatpush3.msra.mxu1 %v341_v40 }
  0x23   :  { %1564 = vmatprep.mubr.msk.f32.mxu0 %vm60_vm1, %v38_v18  ;;  %1607 = vmatprep.subr.mxu1 %v1748_v28 }
  0x24   :  { %1656 = vmatpush3.msra.mxu0 %v1977_v43 }
  0x25   :  { %1657 = vmatprep.subr.mxu0 %v1748_v28 }
  0x26   :  { %1565 = vmatmul.mubr.msk.f32.gmra.mxu0 %vm60_vm1, %v39_v19 }
  0x27   :  { %1567 = vmatprep.mubr.msk.f32.mxu0 %vm60_vm1, %v40_v20  ;;  %1658 = vmatpush3.msra.mxu0 %v1984_v44 }
  0x28   :  { %1673 = vmatprep.subr.mxu0 %v1748_v28 }
  0x2a   :  { %1568 = vmatmul.mubr.msk.f32.gmra.mxu0 %vm60_vm1, %v41_v21 }
  0x2b   :  { %1570 = vmatprep.mubr.msk.f32.mxu0 %vm60_vm1, %v42_v22 }
  0x2e   :  { %1571 = vmatmul.mubr.msk.f32.gmra.mxu0 %vm60_vm1, %v43_v23 }
  0x2f   :  { %1573 = vmatprep.mubr.msk.f32.mxu0 %vm60_vm1, %v44_v24 }
  0x32   :  { %1574 = vmatmul.mubr.msk.f32.gmra.mxu0 %vm60_vm1, %v45_v25 }
  0x33   :  { %1576 = vmatprep.mubr.msk.f32.mxu0 %vm60_vm1, %v46_v26 }
  0x36   :  { %1577 = vmatmul.mubr.msk.f32.gmra.mxu0 %vm60_vm1, %v47_v27 }
  0x37   :  { %1659 = vmatprep.mubr.msk.f32.mxu0 %vm1749_vm2, %v1748_v28 }
  0xda   :  { %v1557_v45 = vpop.f32.mrf.mxu0 }
  0xdb   :  { %v260_v47 = vsel %vm258_vm5, %v1557_v45, -inf }
  0xdc   :  { %v179_v46 = vpop.f32.mrf.mxu0 }
  0xdd   :  { %v259_v48 = vsel %vm258_vm5, %v179_v46, -inf }
  0xde   :  { %v261_v49 = vmax.f32 %v259_v48, %v260_v47  ;;  %v1560_v50 = vpop.f32.mrf.mxu0 }
  0xdf   :  { %v271_v53 = vsel %vm258_vm5, %v1560_v50, -inf }
  0xe0   :  { %v262_v51 = vrot.slane %v261_v49, 4  ;;  %v189_v52 = vpop.f32.mrf.mxu0 }
  0xe1   :  { %v270_v54 = vsel %vm258_vm5, %v189_v52, -inf }
  0xe2   :  { %v263_v55 = vmax.f32 %v261_v49, %v262_v51  ;;  %v272_v56 = vmax.f32 %v270_v54, %v271_v53  ;;  %v1563_v57 = vpop.f32.mrf.mxu0 }
  0xe3   :  { %v281_v61 = vsel %vm258_vm5, %v1563_v57, -inf }
  0xe4   :  { %v264_v58 = vrot.slane %v263_v55, 2  ;;  %v273_v59 = vrot.slane %v272_v56, 4  ;;  %v199_v60 = vpop.f32.mrf.mxu0 }
  0xe5   :  { %v280_v62 = vsel %vm258_vm5, %v199_v60, -inf }
  0xe6   :  { %v265_v63 = vmax.f32 %v263_v55, %v264_v58  ;;  %v274_v0 = vmax.f32 %v272_v56, %v273_v59  ;;  %v282_v1 = vmax.f32 %v280_v62, %v281_v61  ;;  %v1566_v2 = vpop.f32.mrf.mxu0 }
  0xe7   :  { %v291_v7 = vsel %vm258_vm5, %v1566_v2, -inf }
  0xe8   :  { %v266_v3 = vrot.slane %v265_v63, 1  ;;  %v275_v4 = vrot.slane %v274_v0, 2  ;;  %v283_v5 = vrot.slane %v282_v1, 4  ;;  %v209_v6 = vpop.f32.mrf.mxu0 }
  0xe9   :  { %v290_v8 = vsel %vm258_vm5, %v209_v6, -inf }
  0xea   :  { %v267_v9 = vmax.f32 %v265_v63, %v266_v3  ;;  %v276_v10 = vmax.f32 %v274_v0, %v275_v4  ;;  %v284_v11 = vmax.f32 %v282_v1, %v283_v5  ;;  %v292_v12 = vmax.f32 %v290_v8, %v291_v7  ;;  %v1569_v13 = vpop.f32.mrf.mxu0 }
  0xeb   :  { %v301_v18 = vsel %vm258_vm5, %v1569_v13, -inf }
  0xec   :  { %269 = vst.msk [vmem:[#allocation2] sm:$0x1] %vm268_vm6, %v267_v9  ;;  %v277_v14 = vrot.slane %v276_v10, 1  ;;  %v285_v15 = vrot.slane %v284_v11, 2  ;;  %v293_v16 = vrot.slane %v292_v12, 4  ;;  %v219_v17 = vpop.f32.mrf.mxu0 }
  0xed   :  { %v300_v19 = vsel %vm258_vm5, %v219_v17, -inf }
  0xee   :  { %v278_v20 = vmax.f32 %v276_v10, %v277_v14  ;;  %v286_v21 = vmax.f32 %v284_v11, %v285_v15  ;;  %v294_v22 = vmax.f32 %v292_v12, %v293_v16  ;;  %v302_v23 = vmax.f32 %v300_v19, %v301_v18  ;;  %v1572_v24 = vpop.f32.mrf.mxu0  ;;  %v520_v11 = vld [vmem:[%s2215_s8] sm:$0x1]  ;;  %v426_v12 = vpop.f32.mrf.mxu1 }
  0xef   :  { %v311_v30 = vsel %vm258_vm5, %v1572_v24, -inf  ;;  %v2041_v16 = vld [vmem:[%s2216_s7] sm:$0x1]  ;;  %s1752_s7 = smov 32  }
  0xf0   :  { %279 = vst.msk [vmem:[#allocation2 + $0x1] sm:$0x1] %vm268_vm6, %v278_v20  ;;  %v287_v25 = vrot.slane %v286_v21, 1  ;;  %v295_v26 = vrot.slane %v294_v22, 2  ;;  %v303_v27 = vrot.slane %v302_v23, 4  ;;  %v229_v29 = vpop.f32.mrf.mxu0  ;;  %v1595_v13 = vpop.f32.mrf.mxu1 }
  0xf1   :  { %v310_v31 = vsel %vm258_vm5, %v229_v29, -inf }
  0xf2   :  { %v288_v32 = vmax.f32 %v286_v21, %v287_v25  ;;  %v296_v33 = vmax.f32 %v294_v22, %v295_v26  ;;  %v304_v34 = vmax.f32 %v302_v23, %v303_v27  ;;  %v312_v35 = vmax.f32 %v310_v31, %v311_v30  ;;  %v1575_v36 = vpop.f32.mrf.mxu0  ;;  %v1433_v21 = vld [vmem:[%s2217_s5] ss:$0 sm:$0xff]  ;;  %s1751_s5 = smov 96  }
  0xf3   :  { %v321_v45 = vsel %vm258_vm5, %v1575_v36, -inf }
  0xf4   :  { %289 = vst.msk [vmem:[#allocation2 + $0x2] sm:$0x1] %vm268_vm6, %v288_v32  ;;  %v297_v37 = vrot.slane %v296_v33, 1  ;;  %v305_v38 = vrot.slane %v304_v34, 2  ;;  %v313_v39 = vrot.slane %v312_v35, 4  ;;  %v239_v40 = vpop.f32.mrf.mxu0 }
  0xf5   :  { %v320_v46 = vsel %vm258_vm5, %v239_v40, -inf }
  0xf6   :  { %v298_v47 = vmax.f32 %v296_v33, %v297_v37  ;;  %v306_v48 = vmax.f32 %v304_v34, %v305_v38  ;;  %v314_v49 = vmax.f32 %v312_v35, %v313_v39  ;;  %v322_v50 = vmax.f32 %v320_v46, %v321_v45  ;;  %v1578_v51 = vpop.f32.mrf.mxu0 }
  0xf7   :  { %v331_v56 = vsel %vm258_vm5, %v1578_v51, -inf  ;;  %v619_v33 = vlaneseq }
  0xf8   :  { %299 = vst.msk [vmem:[#allocation2 + $0x3] sm:$0x1] %vm268_vm6, %v298_v47  ;;  %v307_v52 = vrot.slane %v306_v48, 1  ;;  %v315_v53 = vrot.slane %v314_v49, 2  ;;  %v323_v54 = vrot.slane %v322_v50, 4  ;;  %v249_v55 = vpop.f32.mrf.mxu0 }
  0xf9   :  { %v330_v57 = vsel %vm258_vm5, %v249_v55, -inf  ;;  %v620_v34 = vshrl.u32 %v619_v33, 7 }
  0xfa   :  { %v308_v58 = vmax.f32 %v306_v48, %v307_v52  ;;  %v316_v59 = vmax.f32 %v314_v49, %v315_v53  ;;  %v324_v60 = vmax.f32 %v322_v50, %v323_v54  ;;  %v332_v61 = vmax.f32 %v330_v57, %v331_v56 }
  0xfb   :  { %v621_v35 = vsub.s32 0, %v620_v34 }
  0xfc   :  { %309 = vst.msk [vmem:[#allocation2 + $0x4] sm:$0x1] %vm268_vm6, %v308_v58  ;;  %v317_v62 = vrot.slane %v316_v59, 1  ;;  %v325_v63 = vrot.slane %v324_v60, 2  ;;  %v333_v0 = vrot.slane %v332_v61, 4 }
  0xfd   :  { %v622_v37 = vrot.slane %v520_v11, %v621_v35 }
  0xfe   :  { %v318_v1 = vmax.f32 %v316_v59, %v317_v62  ;;  %v326_v2 = vmax.f32 %v324_v60, %v325_v63  ;;  %v334_v3 = vmax.f32 %v332_v61, %v333_v0 }
 0x100   :  { %319 = vst.msk [vmem:[#allocation2 + $0x5] sm:$0x1] %vm268_vm6, %v318_v1  ;;  %v327_v4 = vrot.slane %v326_v2, 1  ;;  %v335_v5 = vrot.slane %v334_v3, 2 }
 0x102   :  { %v328_v6 = vmax.f32 %v326_v2, %v327_v4  ;;  %v336_v7 = vmax.f32 %v334_v3, %v335_v5 }
 0x104   :  { %329 = vst.msk [vmem:[#allocation2 + $0x6] sm:$0x1] %vm268_vm6, %v328_v6  ;;  %v337_v8 = vrot.slane %v336_v7, 1 }
 0x106   :  { %v338_v9 = vmax.f32 %v336_v7, %v337_v8 }
 0x108   :  { %339 = vst.msk [vmem:[#allocation2 + $0x7] sm:$0x1] %vm268_vm6, %v338_v9 }
 0x10f   :  { %v340_v10 = vld [vmem:[#allocation2] sm:$0xff] }
 0x110   :  { %1605 = vmatmul.mubr.msk.f32.vlgmr.msra.gmra.mxu1 %vm258_vm5, %v340_v10 }
 0x111   :  { %1608 = vmatpush3.msra.mxu1 %v1964_v41  ;;  %1615 = vmatprep.mubr.msk.f32.mxu1 %vm1749_vm2, %v1748_v28 }
 0x112   :  { %1609 = vmatprep.subr.mxu1 %v1748_v28 }
 0x113   :  { %1610 = vmatpush3.msra.mxu1 %v1971_v42 }
 0x114   :  { %1611 = vmatprep.subr.mxu1 %v1748_v28 }
 0x115   :  { %1612 = vmatpush3.msra.mxu1 %v1977_v43 }
 0x116   :  { %1613 = vmatprep.subr.mxu1 %v1748_v28 }
 0x117   :  { %1614 = vmatpush3.msra.mxu1 %v1984_v44 }
 0x118   :  { %1616 = vmatmul.mubr.msk.f32.vlgmr.msra.gmra.mxu1 %vm521_vm7, %v520_v11  ;;  %1618 = vmatprep.subr.mxu1 %v1748_v28 }
 0x119   :  { %1619 = vmatpush3.msra.mxu1 %v1964_v41  ;;  %1626 = vmatprep.mubr.msk.f32.mxu1 %vm1749_vm2, %v1748_v28 }
 0x11a   :  { %1620 = vmatprep.subr.mxu1 %v1748_v28 }
 0x11b   :  { %1621 = vmatpush3.msra.mxu1 %v1971_v42 }
 0x11c   :  { %1622 = vmatprep.subr.mxu1 %v1748_v28 }
 0x11d   :  { %1623 = vmatpush3.msra.mxu1 %v1977_v43 }
 0x11e   :  { %1624 = vmatprep.subr.mxu1 %v1748_v28 }
 0x11f   :  { %1625 = vmatpush3.msra.mxu1 %v1984_v44 }
 0x120   :  { %1629 = vmatprep.subr.mxu1 %v1748_v28 }
 0x1d0   :  { %v503_v14 = vpop.f32.mrf.mxu1 }
 0x1d1   :  { %v504_v20 = vadd.f32 %v503_v14, %v426_v12 }
 0x1d2   :  { %v1606_v15 = vpop.f32.mrf.mxu1 }
 0x1d3   :  { %v2048_v22 = vadd.f32 %v1433_v21, %v504_v20 }
 0x1d8   :  { %v591_v17 = vpop.f32.mrf.mxu1 }
 0x1d9   :  { %v592_v18 = vadd.f32 %v591_v17, %v2041_v16 }
 0x1da   :  { %v1617_v19 = vpop.f32.mrf.mxu1 }
 0x1db   :  { %603 = vrot.lane.b32.xlu0 %v592_v18, %s1750_s28  ;;  %v595_v23 = vadd.f32 %v592_v18, %v2048_v22 }
 0x1dd   :  { %v1435_v24 = vmul.f32 -1.442695, %v595_v23 }
 0x1df   :  { %1700 = vpow2.f32 %v1435_v24 }
 0x1ec   :  { %v1701_v25 = vpop.eup %1700 }
 0x1ed   :  { %v599_v26 = vadd.f32 1.0, %v1701_v25 }
 0x1ef   :  { %1702 = vrcp.f32 %v599_v26 }
 0x1fc   :  { %v1703_v27 = vpop.eup %1702 }
 0x1fd   :  { %v613_v39 = vsub.f32 1.0, %v1703_v27 }
 0x24d   :  { %v604_v29 = vpop.permute.xlu0 %603 }
 0x24e   :  { %v606_v30 = vmul.f32 %v1703_v27, %v604_v29 }
 0x250   :  { %608 = vrot.lane.b32.xlu0 %v606_v30, %s1750_s28 }
 0x2c2   :  { %v609_v31 = vpop.permute.xlu0 %608 }
 0x2c3   :  { %v611_v32 = vadd.f32 %v609_v31, %v2048_v22 }
 0x2c5   :  { %1704 = vtanh.f32 %v611_v32 }
 0x2d2   :  { %v1705_v36 = vpop.eup %1704 }
 0x2d3   :  { %615 = vrot.lane.b32.xlu1 %v1705_v36, %s1751_s5 }
 0x2d7   :  { %623 = vrot.lane.b32.xlu1 %v622_v37, %s1752_s7 }
 0x345   :  { %v616_v38 = vpop.permute.xlu1 %615 }
 0x346   :  { %v618_v45 = vmul.f32 %v616_v38, %v613_v39 }
 0x349   :  { %v624_v40 = vpop.permute.xlu1 %623 }
 0x34a   :  { %v626_v46 = vmul.f32 %v1703_v27, %v624_v40 }
 0x34c   :  { %v627_v47 = vadd.f32 %v626_v46, %v618_v45 }
 0x34e   :  { %629 = vrot.lane.b32.xlu0 %v627_v47, %s1751_s5  ;;  %v732_v63 = vrot.slane %v627_v47, 7 }
 0x3c0   :  { %v630_v48 = vpop.permute.xlu0 %629 }
 0x3c1   :  { %633 = vst.msk [vmem:[%s2218_s9] sm:$0x1] %vm632_vm8, %v630_v48  ;;  %1627 = vmatmul.mubr.msk.f32.vlgmr.msra.gmra.mxu1 %vm521_vm7, %v630_v48 }
 0x3c2   :  { %1630 = vmatpush3.msra.mxu1 %v1964_v41  ;;  %1637 = vmatprep.mubr.msk.f32.mxu1 %vm1749_vm2, %v1748_v28 }
 0x3c3   :  { %1631 = vmatprep.subr.mxu1 %v1748_v28 }
 0x3c4   :  { %1632 = vmatpush3.msra.mxu1 %v1971_v42 }
 0x3c5   :  { %1633 = vmatprep.subr.mxu1 %v1748_v28 }
 0x3c6   :  { %1634 = vmatpush3.msra.mxu1 %v1977_v43 }
 0x3c7   :  { %1635 = vmatprep.subr.mxu1 %v1748_v28 }
 0x3c8   :  { %1636 = vmatpush3.msra.mxu1 %v1984_v44 }
 0x3c9   :  { %1640 = vmatprep.subr.mxu1 %v1748_v28 }
 0x481   :  { %v702_v49 = vpop.f32.mrf.mxu1 }
 0x482   :  { %v703_v50 = vadd.f32 %v702_v49, %v2041_v16 }
 0x483   :  { %v1628_v51 = vpop.f32.mrf.mxu1 }
 0x484   :  { %v707_v52 = vrot.slane %v703_v50, 7 }
 0x486   :  { %716 = vrot.lane.b32.xlu1 %v707_v52, %s1750_s28  ;;  %v709_v53 = vadd.f32 %v707_v52, %v2048_v22 }
 0x488   :  { %v1437_v54 = vmul.f32 -1.442695, %v709_v53 }
 0x48a   :  { %1706 = vpow2.f32 %v1437_v54 }
 0x497   :  { %v1707_v55 = vpop.eup %1706 }
 0x498   :  { %v713_v56 = vadd.f32 1.0, %v1707_v55 }
 0x49a   :  { %1708 = vrcp.f32 %v713_v56 }
 0x4a7   :  { %v1709_v57 = vpop.eup %1708 }
 0x4a8   :  { %v726_v0 = vsub.f32 1.0, %v1709_v57  ;;  %v734_v2 = vmul.f32 %v1709_v57, %v732_v63 }
 0x4f8   :  { %v717_v58 = vpop.permute.xlu1 %716 }
 0x4f9   :  { %v719_v59 = vmul.f32 %v1709_v57, %v717_v58 }
 0x4fb   :  { %721 = vrot.lane.b32.xlu0 %v719_v59, %s1750_s28 }
 0x56d   :  { %v722_v60 = vpop.permute.xlu0 %721 }
 0x56e   :  { %v724_v61 = vadd.f32 %v722_v60, %v2048_v22 }
 0x570   :  { %1710 = vtanh.f32 %v724_v61 }
 0x57d   :  { %v1711_v62 = vpop.eup %1710 }
 0x57e   :  { %728 = vrot.lane.b32.xlu1 %v1711_v62, %s1751_s5 }
 0x5f0   :  { %v729_v1 = vpop.permute.xlu1 %728 }
 0x5f1   :  { %v731_v3 = vmul.f32 %v729_v1, %v726_v0 }
 0x5f3   :  { %v2075_v4 = vadd.f32 %v734_v2, %v731_v3 }
 0x5f5   :  { %v742_v5 = vrot.slane %v2075_v4, 1  ;;  %v843_v24 = vrot.slane %v2075_v4, 7 }
 0x5f7   :  { %743 = vrot.lane.b32.xlu0 %v742_v5, %s1751_s5 }
 0x669   :  { %v744_v6 = vpop.permute.xlu0 %743 }
 0x66a   :  { %1638 = vmatmul.mubr.msk.f32.vlgmr.msra.gmra.mxu1 %vm521_vm7, %v744_v6 }
 0x66b   :  { %1641 = vmatpush3.msra.mxu1 %v1964_v41  ;;  %1648 = vmatprep.mubr.msk.f32.mxu1 %vm1749_vm2, %v1748_v28 }
 0x66c   :  { %1642 = vmatprep.subr.mxu1 %v1748_v28 }
 0x66d   :  { %1643 = vmatpush3.msra.mxu1 %v1971_v42 }
 0x66e   :  { %1644 = vmatprep.subr.mxu1 %v1748_v28 }
 0x66f   :  { %1645 = vmatpush3.msra.mxu1 %v1977_v43 }
 0x670   :  { %1646 = vmatprep.subr.mxu1 %v1748_v28 }
 0x671   :  { %1647 = vmatpush3.msra.mxu1 %v1984_v44 }
 0x672   :  { %1662 = vmatprep.subr.mxu1 %v1748_v28 }
 0x72a   :  { %v813_v7 = vpop.f32.mrf.mxu1 }
 0x72b   :  { %v814_v8 = vadd.f32 %v813_v7, %v2041_v16 }
 0x72c   :  { %v1639_v9 = vpop.f32.mrf.mxu1 }
 0x72d   :  { %v818_v10 = vrot.slane %v814_v8, 6 }
 0x72f   :  { %827 = vrot.lane.b32.xlu1 %v818_v10, %s1750_s28  ;;  %v820_v11 = vadd.f32 %v818_v10, %v2048_v22 }
 0x731   :  { %v1439_v12 = vmul.f32 -1.442695, %v820_v11 }
 0x733   :  { %1712 = vpow2.f32 %v1439_v12 }
 0x740   :  { %v1713_v13 = vpop.eup %1712 }
 0x741   :  { %v824_v14 = vadd.f32 1.0, %v1713_v13 }
 0x743   :  { %1714 = vrcp.f32 %v824_v14 }
 0x750   :  { %v1715_v15 = vpop.eup %1714 }
 0x751   :  { %v837_v23 = vsub.f32 1.0, %v1715_v15  ;;  %v845_v26 = vmul.f32 %v1715_v15, %v843_v24 }
 0x7a1   :  { %v828_v17 = vpop.permute.xlu1 %827 }
 0x7a2   :  { %v830_v18 = vmul.f32 %v1715_v15, %v828_v17 }
 0x7a4   :  { %832 = vrot.lane.b32.xlu0 %v830_v18, %s1750_s28 }
 0x816   :  { %v833_v19 = vpop.permute.xlu0 %832 }
 0x817   :  { %v835_v20 = vadd.f32 %v833_v19, %v2048_v22 }
 0x819   :  { %1716 = vtanh.f32 %v835_v20 }
 0x826   :  { %v1717_v21 = vpop.eup %1716 }
 0x827   :  { %839 = vrot.lane.b32.xlu1 %v1717_v21, %s1751_s5 }
 0x899   :  { %v840_v25 = vpop.permute.xlu1 %839 }
 0x89a   :  { %v842_v27 = vmul.f32 %v840_v25, %v837_v23 }
 0x89c   :  { %v2097_v29 = vadd.f32 %v845_v26, %v842_v27 }
 0x89e   :  { %v853_v30 = vrot.slane %v2097_v29, 2  ;;  %v954_v51 = vrot.slane %v2097_v29, 7 }
 0x8a0   :  { %854 = vrot.lane.b32.xlu0 %v853_v30, %s1751_s5 }
 0x912   :  { %v855_v31 = vpop.permute.xlu0 %854 }
 0x913   :  { %1649 = vmatmul.mubr.msk.f32.vlgmr.msra.gmra.mxu1 %vm521_vm7, %v855_v31 }
 0x914   :  { %1663 = vmatpush3.msra.mxu1 %v1964_v41  ;;  %1670 = vmatprep.mubr.msk.f32.mxu1 %vm1749_vm2, %v1748_v28 }
 0x915   :  { %1664 = vmatprep.subr.mxu1 %v1748_v28 }
 0x916   :  { %1665 = vmatpush3.msra.mxu1 %v1971_v42 }
 0x917   :  { %1666 = vmatprep.subr.mxu1 %v1748_v28 }
 0x918   :  { %1667 = vmatpush3.msra.mxu1 %v1977_v43 }
 0x919   :  { %1668 = vmatprep.subr.mxu1 %v1748_v28 }
 0x91a   :  { %1669 = vmatpush3.msra.mxu1 %v1984_v44 }
 0x91b   :  { %1684 = vmatprep.subr.mxu1 %v1748_v28 }
 0x9d3   :  { %v924_v32 = vpop.f32.mrf.mxu1 }
 0x9d4   :  { %v925_v33 = vadd.f32 %v924_v32, %v2041_v16 }
 0x9d5   :  { %v1650_v34 = vpop.f32.mrf.mxu1 }
 0x9d6   :  { %v929_v35 = vrot.slane %v925_v33, 5 }
 0x9d8   :  { %938 = vrot.lane.b32.xlu1 %v929_v35, %s1750_s28  ;;  %v931_v36 = vadd.f32 %v929_v35, %v2048_v22 }
 0x9da   :  { %v1441_v37 = vmul.f32 -1.442695, %v931_v36 }
 0x9dc   :  { %1718 = vpow2.f32 %v1441_v37 }
 0x9e9   :  { %v1719_v38 = vpop.eup %1718 }
 0x9ea   :  { %v935_v39 = vadd.f32 1.0, %v1719_v38 }
 0x9ec   :  { %1720 = vrcp.f32 %v935_v39 }
 0x9f9   :  { %v1721_v40 = vpop.eup %1720 }
 0x9fa   :  { %v948_v50 = vsub.f32 1.0, %v1721_v40  ;;  %v956_v53 = vmul.f32 %v1721_v40, %v954_v51 }
 0xa4a   :  { %v939_v45 = vpop.permute.xlu1 %938 }
 0xa4b   :  { %v941_v46 = vmul.f32 %v1721_v40, %v939_v45 }
 0xa4d   :  { %943 = vrot.lane.b32.xlu0 %v941_v46, %s1750_s28 }
 0xabf   :  { %v944_v47 = vpop.permute.xlu0 %943 }
 0xac0   :  { %v946_v48 = vadd.f32 %v944_v47, %v2048_v22 }
 0xac2   :  { %1722 = vtanh.f32 %v946_v48 }
 0xacf   :  { %v1723_v49 = vpop.eup %1722 }
 0xad0   :  { %950 = vrot.lane.b32.xlu1 %v1723_v49, %s1751_s5 }
 0xb42   :  { %v951_v52 = vpop.permute.xlu1 %950 }
 0xb43   :  { %v953_v54 = vmul.f32 %v951_v52, %v948_v50 }
 0xb45   :  { %v2119_v55 = vadd.f32 %v956_v53, %v953_v54 }
 0xb47   :  { %v964_v56 = vrot.slane %v2119_v55, 3  ;;  %v1065_v10 = vrot.slane %v2119_v55, 7 }
 0xb49   :  { %965 = vrot.lane.b32.xlu0 %v964_v56, %s1751_s5 }
 0xbbb   :  { %v966_v57 = vpop.permute.xlu0 %965 }
 0xbbc   :  { %1660 = vmatmul.mubr.msk.f32.vlgmr.msra.gmra.mxu0 %vm521_vm7, %v966_v57 }
 0xbbd   :  { %1674 = vmatpush3.msra.mxu0 %v1964_v41  ;;  %1681 = vmatprep.mubr.msk.f32.mxu0 %vm1749_vm2, %v1748_v28 }
 0xbbe   :  { %1675 = vmatprep.subr.mxu0 %v1748_v28 }
 0xbbf   :  { %1676 = vmatpush3.msra.mxu0 %v1971_v42 }
 0xbc0   :  { %1677 = vmatprep.subr.mxu0 %v1748_v28 }
 0xbc1   :  { %1678 = vmatpush3.msra.mxu0 %v1977_v43 }
 0xbc2   :  { %1679 = vmatprep.subr.mxu0 %v1748_v28 }
 0xbc3   :  { %1680 = vmatpush3.msra.mxu0 %v1984_v44 }
 0xc7c   :  { %v1035_v58 = vpop.f32.mrf.mxu0 }
 0xc7d   :  { %v1036_v59 = vadd.f32 %v1035_v58, %v2041_v16 }
 0xc7e   :  { %v1661_v60 = vpop.f32.mrf.mxu0 }
 0xc7f   :  { %v1040_v61 = vrot.slane %v1036_v59, 4 }
 0xc81   :  { %1049 = vrot.lane.b32.xlu1 %v1040_v61, %s1750_s28  ;;  %v1042_v62 = vadd.f32 %v1040_v61, %v2048_v22 }
 0xc83   :  { %v1443_v63 = vmul.f32 -1.442695, %v1042_v62 }
 0xc85   :  { %1724 = vpow2.f32 %v1443_v63 }
 0xc92   :  { %v1725_v0 = vpop.eup %1724 }
 0xc93   :  { %v1046_v1 = vadd.f32 1.0, %v1725_v0 }
 0xc95   :  { %1726 = vrcp.f32 %v1046_v1 }
 0xca2   :  { %v1727_v2 = vpop.eup %1726 }
 0xca3   :  { %v1059_v9 = vsub.f32 1.0, %v1727_v2  ;;  %v1067_v12 = vmul.f32 %v1727_v2, %v1065_v10 }
 0xcf3   :  { %v1050_v3 = vpop.permute.xlu1 %1049 }
 0xcf4   :  { %v1052_v5 = vmul.f32 %v1727_v2, %v1050_v3 }
 0xcf6   :  { %1054 = vrot.lane.b32.xlu0 %v1052_v5, %s1750_s28 }
 0xd68   :  { %v1055_v6 = vpop.permute.xlu0 %1054 }
 0xd69   :  { %v1057_v7 = vadd.f32 %v1055_v6, %v2048_v22 }
 0xd6b   :  { %1728 = vtanh.f32 %v1057_v7 }
 0xd78   :  { %v1729_v8 = vpop.eup %1728 }
 0xd79   :  { %1061 = vrot.lane.b32.xlu1 %v1729_v8, %s1751_s5 }
 0xdeb   :  { %v1062_v11 = vpop.permute.xlu1 %1061 }
 0xdec   :  { %v1064_v13 = vmul.f32 %v1062_v11, %v1059_v9 }
 0xdee   :  { %v2140_v14 = vadd.f32 %v1067_v12, %v1064_v13 }
 0xdf0   :  { %v1075_v15 = vrot.slane %v2140_v14, 4  ;;  %v1176_v31 = vrot.slane %v2140_v14, 7 }
 0xdf2   :  { %1076 = vrot.lane.b32.xlu0 %v1075_v15, %s1751_s5 }
 0xe64   :  { %v1077_v17 = vpop.permute.xlu0 %1076 }
 0xe65   :  { %1671 = vmatmul.mubr.msk.f32.vlgmr.msra.gmra.mxu1 %vm521_vm7, %v1077_v17 }
 0xe66   :  { %1685 = vmatpush3.msra.mxu1 %v1964_v41  ;;  %1692 = vmatprep.mubr.msk.f32.mxu1 %vm1749_vm2, %v1748_v28 }
 0xe67   :  { %1686 = vmatprep.subr.mxu1 %v1748_v28 }
 0xe68   :  { %1687 = vmatpush3.msra.mxu1 %v1971_v42 }
 0xe69   :  { %1688 = vmatprep.subr.mxu1 %v1748_v28 }
 0xe6a   :  { %1689 = vmatpush3.msra.mxu1 %v1977_v43 }
 0xe6b   :  { %1690 = vmatprep.subr.mxu1 %v1748_v28 }
 0xe6c   :  { %1691 = vmatpush3.msra.mxu1 %v1984_v44 }
 0xf25   :  { %v1146_v18 = vpop.f32.mrf.mxu1 }
 0xf26   :  { %v1147_v19 = vadd.f32 %v1146_v18, %v2041_v16 }
 0xf27   :  { %v1672_v20 = vpop.f32.mrf.mxu1 }
 0xf28   :  { %v1151_v41 = vrot.slane %v1147_v19, 3 }
 0xf2a   :  { %1160 = vrot.lane.b32.xlu1 %v1151_v41, %s1750_s28  ;;  %v1153_v21 = vadd.f32 %v1151_v41, %v2048_v22 }
 0xf2c   :  { %v1445_v23 = vmul.f32 -1.442695, %v1153_v21 }
 0xf2e   :  { %1730 = vpow2.f32 %v1445_v23 }
 0xf3b   :  { %v1731_v42 = vpop.eup %1730 }
 0xf3c   :  { %v1157_v24 = vadd.f32 1.0, %v1731_v42 }
 0xf3e   :  { %1732 = vrcp.f32 %v1157_v24 }
 0xf4b   :  { %v1733_v25 = vpop.eup %1732 }
 0xf4c   :  { %v1170_v30 = vsub.f32 1.0, %v1733_v25  ;;  %v1178_v33 = vmul.f32 %v1733_v25, %v1176_v31 }
 0xf9c   :  { %v1161_v43 = vpop.permute.xlu1 %1160 }
 0xf9d   :  { %v1163_v26 = vmul.f32 %v1733_v25, %v1161_v43 }
 0xf9f   :  { %1165 = vrot.lane.b32.xlu0 %v1163_v26, %s1750_s28 }
0x1011   :  { %v1166_v28 = vpop.permute.xlu0 %1165 }
0x1012   :  { %v1168_v44 = vadd.f32 %v1166_v28, %v2048_v22 }
0x1014   :  { %1734 = vtanh.f32 %v1168_v44 }
0x1021   :  { %v1735_v27 = vpop.eup %1734 }
0x1022   :  { %1172 = vrot.lane.b32.xlu1 %v1735_v27, %s1751_s5 }
0x1094   :  { %v1173_v32 = vpop.permute.xlu1 %1172 }
0x1095   :  { %v1175_v34 = vmul.f32 %v1173_v32, %v1170_v30 }
0x1097   :  { %v1179_v35 = vadd.f32 %v1178_v33, %v1175_v34 }
0x1099   :  { %v1186_v36 = vrot.slane %v1179_v35, 5  ;;  %v1287_v58 = vrot.slane %v1179_v35, 7 }
0x109b   :  { %1187 = vrot.lane.b32.xlu0 %v1186_v36, %s1751_s5 }
0x110d   :  { %v1188_v37 = vpop.permute.xlu0 %1187 }
0x110e   :  { %1682 = vmatmul.mubr.msk.f32.vlgmr.msra.gmra.mxu0 %vm521_vm7, %v1188_v37 }
0x11ce   :  { %v1257_v38 = vpop.f32.mrf.mxu0 }
0x11cf   :  { %v1258_v39 = vadd.f32 %v1257_v38, %v2041_v16 }
0x11d0   :  { %v1683_v40 = vpop.f32.mrf.mxu0 }
0x11d1   :  { %v1262_v45 = vrot.slane %v1258_v39, 2 }
0x11d3   :  { %1271 = vrot.lane.b32.xlu1 %v1262_v45, %s1750_s28  ;;  %v1264_v46 = vadd.f32 %v1262_v45, %v2048_v22 }
0x11d5   :  { %v1447_v47 = vmul.f32 -1.442695, %v1264_v46 }
0x11d7   :  { %1736 = vpow2.f32 %v1447_v47 }
0x11e4   :  { %v1737_v48 = vpop.eup %1736 }
0x11e5   :  { %v1268_v49 = vadd.f32 1.0, %v1737_v48 }
0x11e7   :  { %1738 = vrcp.f32 %v1268_v49 }
0x11f4   :  { %v1739_v50 = vpop.eup %1738 }
0x11f5   :  { %v1281_v57 = vsub.f32 1.0, %v1739_v50  ;;  %v1289_v60 = vmul.f32 %v1739_v50, %v1287_v58 }
0x1245   :  { %v1272_v51 = vpop.permute.xlu1 %1271 }
0x1246   :  { %v1274_v52 = vmul.f32 %v1739_v50, %v1272_v51 }
0x1248   :  { %1276 = vrot.lane.b32.xlu0 %v1274_v52, %s1750_s28 }
0x12ba   :  { %v1277_v53 = vpop.permute.xlu0 %1276 }
0x12bb   :  { %v1279_v54 = vadd.f32 %v1277_v53, %v2048_v22 }
0x12bd   :  { %1740 = vtanh.f32 %v1279_v54 }
0x12ca   :  { %v1741_v56 = vpop.eup %1740 }
0x12cb   :  { %1283 = vrot.lane.b32.xlu1 %v1741_v56, %s1751_s5 }
0x133d   :  { %v1284_v59 = vpop.permute.xlu1 %1283 }
0x133e   :  { %v1286_v61 = vmul.f32 %v1284_v59, %v1281_v57 }
0x1340   :  { %v1290_v62 = vadd.f32 %v1289_v60, %v1286_v61 }
0x1342   :  { %v1297_v63 = vrot.slane %v1290_v62, 6  ;;  %v1398_v18 = vrot.slane %v1290_v62, 7 }
0x1344   :  { %1298 = vrot.lane.b32.xlu0 %v1297_v63, %s1751_s5 }
0x13b6   :  { %v1299_v0 = vpop.permute.xlu0 %1298 }
0x13b7   :  { %1693 = vmatmul.mubr.msk.f32.vlgmr.msra.gmra.mxu1 %vm521_vm7, %v1299_v0 }
0x1477   :  { %v1368_v1 = vpop.f32.mrf.mxu1 }
0x1478   :  { %v1369_v2 = vadd.f32 %v1368_v1, %v2041_v16 }
0x1479   :  { %v1694_v3 = vpop.f32.mrf.mxu1 }
0x147a   :  { %v1373_v5 = vrot.slane %v1369_v2, 1 }
0x147c   :  { %1382 = vrot.lane.b32.xlu1 %v1373_v5, %s1750_s28  ;;  %v1375_v6 = vadd.f32 %v1373_v5, %v2048_v22 }
0x147e   :  { %v1449_v7 = vmul.f32 -1.442695, %v1375_v6 }
0x1480   :  { %1742 = vpow2.f32 %v1449_v7 }
0x148d   :  { %v1743_v8 = vpop.eup %1742 }
0x148e   :  { %v1379_v9 = vadd.f32 1.0, %v1743_v8 }
0x1490   :  { %1744 = vrcp.f32 %v1379_v9 }
0x149d   :  { %v1745_v10 = vpop.eup %1744 }
0x149e   :  { %v1400_v20 = vmul.f32 %v1745_v10, %v1398_v18 }
0x14ee   :  { %v1383_v11 = vpop.permute.xlu1 %1382 }
0x14ef   :  { %v1385_v12 = vmul.f32 %v1745_v10, %v1383_v11 }
0x14f1   :  { %1387 = vrot.lane.b32.xlu0 %v1385_v12, %s1750_s28 }
0x14f5   :  { %737 = vrot.lane.b32.xlu0 %v2075_v4, %s1751_s5 }
0x14f9   :  { %959 = vrot.lane.b32.xlu0 %v2119_v55, %s1751_s5  ;;  %v1392_v55 = vsub.f32 1.0, %v1745_v10 }
0x14fd   :  { %1181 = vrot.lane.b32.xlu0 %v1179_v35, %s1751_s5 }
0x1563   :  { %v1388_v16 = vpop.permute.xlu0 %1387 }
0x1564   :  { %v1390_v13 = vadd.f32 %v1388_v16, %v2048_v22 }
0x1566   :  { %1746 = vtanh.f32 %v1390_v13 }
0x1567   :  { %v738_v15 = vpop.permute.xlu0 %737 }
0x1568   :  { %741 = vst.msk [vmem:[%s2218_s9] sm:$0x2] %vm740_vm9, %v738_v15 }
0x156b   :  { %v960_v17 = vpop.permute.xlu0 %959 }
0x156c   :  { %963 = vst.msk [vmem:[%s2218_s9] sm:$0x8] %vm962_vm10, %v960_v17 }
0x156f   :  { %v1182_v4 = vpop.permute.xlu0 %1181 }
0x1570   :  { %1185 = vst.msk [vmem:[%s2218_s9] sm:$0x20] %vm1184_vm11, %v1182_v4 }
0x1573   :  { %v1747_v22 = vpop.eup %1746 }
0x1574   :  { %1394 = vrot.lane.b32.xlu1 %v1747_v22, %s1751_s5 }
0x1578   :  { %848 = vrot.lane.b32.xlu1 %v2097_v29, %s1751_s5 }
0x157c   :  { %1070 = vrot.lane.b32.xlu1 %v2140_v14, %s1751_s5 }
0x1580   :  { %1292 = vrot.lane.b32.xlu1 %v1290_v62, %s1751_s5 }
0x15e6   :  { %v1395_v19 = vpop.permute.xlu1 %1394 }
0x15e7   :  { %v1397_v41 = vmul.f32 %v1395_v19, %v1392_v55 }
0x15e9   :  { %v1401_v21 = vadd.f32 %v1400_v20, %v1397_v41 }
0x15ea   :  { %v849_v23 = vpop.permute.xlu1 %848 }
0x15eb   :  { %852 = vst.msk [vmem:[%s2218_s9] sm:$0x4] %vm851_vm12, %v849_v23  ;;  %1403 = vrot.lane.b32.xlu0 %v1401_v21, %s1751_s5 }
0x15ee   :  { %v1071_v29 = vpop.permute.xlu1 %1070 }
0x15ef   :  { %1074 = vst.msk [vmem:[%s2218_s9] sm:$0x10] %vm1073_vm13, %v1071_v29 }
0x15f2   :  { %v1293_v14 = vpop.permute.xlu1 %1292 }
0x15f3   :  { %1296 = vst.msk [vmem:[%s2218_s9] sm:$0x40] %vm1295_vm14, %v1293_v14 }
0x165d   :  { %v1404_v42 = vpop.permute.xlu0 %1403 }
0x165e   :  { %1407 = vst.msk [vmem:[%s2218_s9] sm:$0x80] %vm1406_vm15, %v1404_v42 }

</bundles_post_ra>
